<compile_context>
chip_gen: v7x
topology: tpu7x:2x2x1
jax: 0.10.0
libtpu: 0.0.40
codegen_flags: <defaults>
</compile_context>

<pallas_src>
import jax
import jax.numpy as jnp
from jax import lax
from jax.experimental import pallas as pl
from jax.experimental.pallas import tpu as pltpu

BN_EPS = 1e-5


def _fold_bn(gamma, beta, mean, var):
    scale = gamma / jnp.sqrt(var + BN_EPS)
    shift = beta - mean * scale
    return scale, shift


def basic_block3d_forward(x_ncdhw, params, *, mxu_dtype=jnp.float32):
    """BasicBlock3d forward (inference). x_ncdhw: (N, C, D, H, W) float32."""
    N, C, D, H, W = x_ncdhw.shape
    S = D * H * W
    NS = N * S
    planes = params["w1"].shape[0]
    assert params["w1"].shape[1] == C and planes == C, (
        "BasicBlock3d with downsample=None requires inplanes == planes")

    # BN folded to per-output-channel affine (inference mode); the scale is
    # folded directly into the conv weights, only the shift stays in-kernel.
    scale1, shift1 = _fold_bn(*params["bn1"])
    scale2, shift2 = _fold_bn(*params["bn2"])
    sh1 = shift1[:, None]                                  # (planes, 1)
    sh2 = shift2[:, None]

    # Weights: (Cout, Cin, kd, kh, kw) -> (kd, Cout, 9*Cin); within a kd slab
    # columns are ordered (kh, kw, ci) with ci fastest, matching the im2col
    # scratch row order built in the kernel.
    def prep_w(w, scale):
        w = w * scale[:, None, None, None, None]           # fold BN scale
        w = jnp.transpose(w, (2, 0, 3, 4, 1))               # (kd, Cout, kh, kw, Cin)
        return w.reshape(3, w.shape[1], 9 * w.shape[-1]).astype(mxu_dtype)

    w1f = prep_w(params["w1"], scale1)                     # (3, planes, 9*C)
    w2f = prep_w(params["w2"], scale2)                     # (3, planes, 9*planes)

    # Tap geometry: with (n, d, h, w) flattened row-major onto the lane axis
    # (p = n*S + d*H*W + h*W + w), tap (kd,kh,kw) is a constant lane offset.
    # Out-of-bounds taps (incl. cross-sample wrap-around of the roll) are zeroed
    # by a per-tap 0/1 mask row -- this IS the pad-1 zero padding, no padded
    # copies anywhere.
    dd = jnp.arange(D).reshape(D, 1, 1)
    hh = jnp.arange(H).reshape(1, H, 1)
    ww = jnp.arange(W).reshape(1, 1, W)
    shifts = []                                            # static python ints
    mask_rows = []
    for kd in range(3):
        for kh in range(3):
            for kw in range(3):
                off = (kd - 1) * H * W + (kh - 1) * W + (kw - 1)
                shifts.append((-off) % NS)
                valid = ((dd + (kd - 1) >= 0) & (dd + (kd - 1) < D) &
                         (hh + (kh - 1) >= 0) & (hh + (kh - 1) < H) &
                         (ww + (kw - 1) >= 0) & (ww + (kw - 1) < W))
                mask_rows.append(jnp.broadcast_to(valid, (D, H, W)).reshape(S))
    masks = jnp.stack(mask_rows, 0).astype(jnp.float32)    # (27, S)
    masks = jnp.tile(masks, (1, N))                        # (27, N*S)

    def kernel(x_ref, w1_ref, sh1_ref, w2_ref, sh2_ref, m_ref, o_ref, col_ref):
        # x_ref: (C, NS) f32, m_ref: (27, NS) 0/1, col_ref: (9*C, NS) scratch.
        x = x_ref[...]

        def conv3x3x3(a, w_ref_):
            # 3x3x3 conv as 3 accumulating per-kd MXU dots (K = 9*C each);
            # the im2col slab for one kd lives in VMEM scratch only.
            acc = None
            for kd in range(3):
                for i in range(9):                         # i = kh*3 + kw
                    t = kd * 9 + i
                    tap = pltpu.roll(a, shifts[t], axis=1)          # XLU lane roll
                    tap = tap * m_ref[t:t + 1, :]                   # zero padding
                    col_ref[i * C:(i + 1) * C, :] = tap.astype(col_ref.dtype)
                part = jnp.dot(w_ref_[kd], col_ref[...],
                               preferred_element_type=jnp.float32)
                acc = part if acc is None else acc + part
            return acc

        # conv1 + BN1 (scale pre-folded) + ReLU
        y1 = jnp.maximum(conv3x3x3(x, w1_ref) + sh1_ref[...], 0.0)
        # conv2 + BN2 + residual (identity = x, already resident) + ReLU
        y2 = jnp.maximum(conv3x3x3(y1, w2_ref) + sh2_ref[...] + x_ref[...], 0.0)

        o_ref[...] = y2.astype(o_ref.dtype)

    # Batch folded into lanes: (N, C, D, H, W) -> (C, N*S).
    x2d = jnp.transpose(x_ncdhw, (1, 0, 2, 3, 4)).reshape(C, NS)

    out2d = pl.pallas_call(
        kernel,
        out_shape=jax.ShapeDtypeStruct((planes, NS), x_ncdhw.dtype),
        scratch_shapes=[pltpu.VMEM((9 * C, NS), mxu_dtype)],
        compiler_params=pltpu.CompilerParams(
            vmem_limit_bytes=32 * 1024 * 1024),
    )(x2d, w1f, sh1, w2f, sh2, masks)

    out = out2d.reshape(planes, N, D, H, W)
    return jnp.transpose(out, (1, 0, 2, 3, 4))             # back to NCDHW


# ----------------------------------------------------------------------------
# Pure-JAX reference (correctness check only)
# ----------------------------------------------------------------------------
def _reference_forward(x, params):
    def conv(a, w):
        return lax.conv_general_dilated(
            a, w, window_strides=(1, 1, 1),
            padding=((1, 1), (1, 1), (1, 1)),
            dimension_numbers=("NCDHW", "OIDHW", "NCDHW"))

    def bn(a, p):
        g, b, m, v = p
        s = g / jnp.sqrt(v + BN_EPS)
        sh = b - m * s
        return a * s[None, :, None, None, None] + sh[None, :, None, None, None]

    out = jax.nn.relu(bn(conv(x, params["w1"]), params["bn1"]))
    out = bn(conv(out, params["w2"]), params["bn2"])
    return jax.nn.relu(out + x)


# ----------------------------------------------------------------------------
# Main
# ----------------------------------------------------------------------------
if __name__ == "__main__":
    # BasicBlock3d(inplanes=8, planes=8, stride=(1, 1), downsample=None)
    N, C, D, H, W = 2, 8, 4, 8, 8
    inplanes = planes = C

    key = jax.random.PRNGKey(0)
    ks = jax.random.split(key, 12)

    x = jax.random.normal(ks[0], (N, C, D, H, W), jnp.float32)

    params = {
        # conv weights in PyTorch layout (Cout, Cin, kd, kh, kw), bias=False
        "w1": 0.1 * jax.random.normal(ks[1], (planes, inplanes, 3, 3, 3),
                                      jnp.float32),
        "w2": 0.1 * jax.random.normal(ks[2], (planes, planes, 3, 3, 3),
                                      jnp.float32),
        # BN3d params (gamma, beta, running_mean, running_var), inference mode
        "bn1": (jax.random.uniform(ks[3], (planes,), minval=0.5, maxval=1.5),
                0.1 * jax.random.normal(ks[4], (planes,)),
                0.1 * jax.random.normal(ks[5], (planes,)),
                jax.random.uniform(ks[6], (planes,), minval=0.5, maxval=1.5)),
        "bn2": (jax.random.uniform(ks[7], (planes,), minval=0.5, maxval=1.5),
                0.1 * jax.random.normal(ks[8], (planes,)),
                0.1 * jax.random.normal(ks[9], (planes,)),
                jax.random.uniform(ks[10], (planes,), minval=0.5, maxval=1.5)),
    }

    out = basic_block3d_forward(x, params)
    out = jax.block_until_ready(out)

    ref = jax.block_until_ready(_reference_forward(x, params))
    assert out.shape == (N, C, D, H, W)
    assert jnp.allclose(out, ref, atol=1e-4, rtol=1e-4), (
        float(jnp.max(jnp.abs(out - ref))))

    print("KERNEL_OK")
</pallas_src>

<mosaic_0001>
module attributes {stable_mosaic.version = 11 : i64} {
  func.func @kernel(%arg0: memref<8x512xf32, #tpu.memory_space<vmem>>, %arg1: memref<3x8x72xf32, #tpu.memory_space<vmem>>, %arg2: memref<8x1xf32, #tpu.memory_space<vmem>>, %arg3: memref<3x8x72xf32, #tpu.memory_space<vmem>>, %arg4: memref<8x1xf32, #tpu.memory_space<vmem>>, %arg5: memref<27x512xf32, #tpu.memory_space<vmem>>, %arg6: memref<8x512xf32, #tpu.memory_space<vmem>>, %arg7: memref<72x512xf32, #tpu.memory_space<vmem>>) attributes {dimension_semantics = [], scalar_prefetch = 0 : i64, scratch_operands = 1 : i64, tpu.core_type = #tpu.core_type<tc>} {
    %c0 = arith.constant 0 : index
    %c0_0 = arith.constant 0 : index
    %0 = vector.load %arg0[%c0, %c0_0] : memref<8x512xf32, #tpu.memory_space<vmem>>, vector<8x512xf32>
    %c73_i32 = arith.constant 73 : i32
    %1 = tpu.dynamic_rotate %0 by %c73_i32 dim 1 : vector<8x512xf32>, i32 -> vector<8x512xf32>
    %c0_1 = arith.constant 0 : index
    %c0_2 = arith.constant 0 : index
    %2 = vector.load %arg5[%c0_1, %c0_2] : memref<27x512xf32, #tpu.memory_space<vmem>>, vector<1x512xf32>
    %3 = vector.broadcast %2 : vector<1x512xf32> to vector<8x512xf32>
    %4 = arith.mulf %1, %3 : vector<8x512xf32>
    %c0_3 = arith.constant 0 : index
    %c0_4 = arith.constant 0 : index
    %5 = vector.load %arg7[%c0_3, %c0_4] : memref<72x512xf32, #tpu.memory_space<vmem>>, vector<8x512xf32>
    tpu.vector_store %arg7[%c0_3, %c0_4], %4 {strides = array<i32>} : memref<72x512xf32, #tpu.memory_space<vmem>>, vector<8x512xf32>,
    %c72_i32 = arith.constant 72 : i32
    %6 = tpu.dynamic_rotate %0 by %c72_i32 dim 1 : vector<8x512xf32>, i32 -> vector<8x512xf32>
    %c1 = arith.constant 1 : index
    %c0_5 = arith.constant 0 : index
    %7 = vector.load %arg5[%c1, %c0_5] : memref<27x512xf32, #tpu.memory_space<vmem>>, vector<1x512xf32>
    %8 = vector.broadcast %7 : vector<1x512xf32> to vector<8x512xf32>
    %9 = arith.mulf %6, %8 : vector<8x512xf32>
    %c8 = arith.constant 8 : index
    %c0_6 = arith.constant 0 : index
    %10 = vector.load %arg7[%c8, %c0_6] : memref<72x512xf32, #tpu.memory_space<vmem>>, vector<8x512xf32>
    tpu.vector_store %arg7[%c8, %c0_6], %9 {strides = array<i32>} : memref<72x512xf32, #tpu.memory_space<vmem>>, vector<8x512xf32>,
    %c71_i32 = arith.constant 71 : i32
    %11 = tpu.dynamic_rotate %0 by %c71_i32 dim 1 : vector<8x512xf32>, i32 -> vector<8x512xf32>
    %c2 = arith.constant 2 : index
    %c0_7 = arith.constant 0 : index
    %12 = vector.load %arg5[%c2, %c0_7] : memref<27x512xf32, #tpu.memory_space<vmem>>, vector<1x512xf32>
    %13 = vector.broadcast %12 : vector<1x512xf32> to vector<8x512xf32>
    %14 = arith.mulf %11, %13 : vector<8x512xf32>
    %c16 = arith.constant 16 : index
    %c0_8 = arith.constant 0 : index
    %15 = vector.load %arg7[%c16, %c0_8] : memref<72x512xf32, #tpu.memory_space<vmem>>, vector<8x512xf32>
    tpu.vector_store %arg7[%c16, %c0_8], %14 {strides = array<i32>} : memref<72x512xf32, #tpu.memory_space<vmem>>, vector<8x512xf32>,
    %c65_i32 = arith.constant 65 : i32
    %16 = tpu.dynamic_rotate %0 by %c65_i32 dim 1 : vector<8x512xf32>, i32 -> vector<8x512xf32>
    %c3 = arith.constant 3 : index
    %c0_9 = arith.constant 0 : index
    %17 = vector.load %arg5[%c3, %c0_9] : memref<27x512xf32, #tpu.memory_space<vmem>>, vector<1x512xf32>
    %18 = vector.broadcast %17 : vector<1x512xf32> to vector<8x512xf32>
    %19 = arith.mulf %16, %18 : vector<8x512xf32>
    %c24 = arith.constant 24 : index
    %c0_10 = arith.constant 0 : index
    %20 = vector.load %arg7[%c24, %c0_10] : memref<72x512xf32, #tpu.memory_space<vmem>>, vector<8x512xf32>
    tpu.vector_store %arg7[%c24, %c0_10], %19 {strides = array<i32>} : memref<72x512xf32, #tpu.memory_space<vmem>>, vector<8x512xf32>,
    %c64_i32 = arith.constant 64 : i32
    %21 = tpu.dynamic_rotate %0 by %c64_i32 dim 1 : vector<8x512xf32>, i32 -> vector<8x512xf32>
    %c4 = arith.constant 4 : index
    %c0_11 = arith.constant 0 : index
    %22 = vector.load %arg5[%c4, %c0_11] : memref<27x512xf32, #tpu.memory_space<vmem>>, vector<1x512xf32>
    %23 = vector.broadcast %22 : vector<1x512xf32> to vector<8x512xf32>
    %24 = arith.mulf %21, %23 : vector<8x512xf32>
    %c32 = arith.constant 32 : index
    %c0_12 = arith.constant 0 : index
    %25 = vector.load %arg7[%c32, %c0_12] : memref<72x512xf32, #tpu.memory_space<vmem>>, vector<8x512xf32>
    tpu.vector_store %arg7[%c32, %c0_12], %24 {strides = array<i32>} : memref<72x512xf32, #tpu.memory_space<vmem>>, vector<8x512xf32>,
    %c63_i32 = arith.constant 63 : i32
    %26 = tpu.dynamic_rotate %0 by %c63_i32 dim 1 : vector<8x512xf32>, i32 -> vector<8x512xf32>
    %c5 = arith.constant 5 : index
    %c0_13 = arith.constant 0 : index
    %27 = vector.load %arg5[%c5, %c0_13] : memref<27x512xf32, #tpu.memory_space<vmem>>, vector<1x512xf32>
    %28 = vector.broadcast %27 : vector<1x512xf32> to vector<8x512xf32>
    %29 = arith.mulf %26, %28 : vector<8x512xf32>
    %c40 = arith.constant 40 : index
    %c0_14 = arith.constant 0 : index
    %30 = vector.load %arg7[%c40, %c0_14] : memref<72x512xf32, #tpu.memory_space<vmem>>, vector<8x512xf32>
    tpu.vector_store %arg7[%c40, %c0_14], %29 {strides = array<i32>} : memref<72x512xf32, #tpu.memory_space<vmem>>, vector<8x512xf32>,
    %c57_i32 = arith.constant 57 : i32
    %31 = tpu.dynamic_rotate %0 by %c57_i32 dim 1 : vector<8x512xf32>, i32 -> vector<8x512xf32>
    %c6 = arith.constant 6 : index
    %c0_15 = arith.constant 0 : index
    %32 = vector.load %arg5[%c6, %c0_15] : memref<27x512xf32, #tpu.memory_space<vmem>>, vector<1x512xf32>
    %33 = vector.broadcast %32 : vector<1x512xf32> to vector<8x512xf32>
    %34 = arith.mulf %31, %33 : vector<8x512xf32>
    %c48 = arith.constant 48 : index
    %c0_16 = arith.constant 0 : index
    %35 = vector.load %arg7[%c48, %c0_16] : memref<72x512xf32, #tpu.memory_space<vmem>>, vector<8x512xf32>
    tpu.vector_store %arg7[%c48, %c0_16], %34 {strides = array<i32>} : memref<72x512xf32, #tpu.memory_space<vmem>>, vector<8x512xf32>,
    %c56_i32 = arith.constant 56 : i32
    %36 = tpu.dynamic_rotate %0 by %c56_i32 dim 1 : vector<8x512xf32>, i32 -> vector<8x512xf32>
    %c7 = arith.constant 7 : index
    %c0_17 = arith.constant 0 : index
    %37 = vector.load %arg5[%c7, %c0_17] : memref<27x512xf32, #tpu.memory_space<vmem>>, vector<1x512xf32>
    %38 = vector.broadcast %37 : vector<1x512xf32> to vector<8x512xf32>
    %39 = arith.mulf %36, %38 : vector<8x512xf32>
    %c56 = arith.constant 56 : index
    %c0_18 = arith.constant 0 : index
    %40 = vector.load %arg7[%c56, %c0_18] : memref<72x512xf32, #tpu.memory_space<vmem>>, vector<8x512xf32>
    tpu.vector_store %arg7[%c56, %c0_18], %39 {strides = array<i32>} : memref<72x512xf32, #tpu.memory_space<vmem>>, vector<8x512xf32>,
    %c55_i32 = arith.constant 55 : i32
    %41 = tpu.dynamic_rotate %0 by %c55_i32 dim 1 : vector<8x512xf32>, i32 -> vector<8x512xf32>
    %c8_19 = arith.constant 8 : index
    %c0_20 = arith.constant 0 : index
    %42 = vector.load %arg5[%c8_19, %c0_20] : memref<27x512xf32, #tpu.memory_space<vmem>>, vector<1x512xf32>
    %43 = vector.broadcast %42 : vector<1x512xf32> to vector<8x512xf32>
    %44 = arith.mulf %41, %43 : vector<8x512xf32>
    %c64 = arith.constant 64 : index
    %c0_21 = arith.constant 0 : index
    %45 = vector.load %arg7[%c64, %c0_21] : memref<72x512xf32, #tpu.memory_space<vmem>>, vector<8x512xf32>
    tpu.vector_store %arg7[%c64, %c0_21], %44 {strides = array<i32>} : memref<72x512xf32, #tpu.memory_space<vmem>>, vector<8x512xf32>,
    %c0_22 = arith.constant 0 : index
    %c0_23 = arith.constant 0 : index
    %c0_24 = arith.constant 0 : index
    %46 = vector.load %arg1[%c0_22, %c0_23, %c0_24] : memref<3x8x72xf32, #tpu.memory_space<vmem>>, vector<1x8x72xf32>
    %47 = vector.shape_cast %46 : vector<1x8x72xf32> to vector<8x72xf32>
    %c0_25 = arith.constant 0 : index
    %c0_26 = arith.constant 0 : index
    %48 = vector.load %arg7[%c0_25, %c0_26] : memref<72x512xf32, #tpu.memory_space<vmem>>, vector<72x512xf32>
    %cst = arith.constant dense<0.000000e+00> : vector<8x512xf32>
    %49 = tpu.matmul %47, %48, %cst {dimension_numbers = #tpu.dot_dimension_numbers<[1], [0], [0], [1], [0, 0, 1, 1], [], []>} : vector<8x72xf32>, vector<72x512xf32>, vector<8x512xf32> -> vector<8x512xf32>
    %c9_i32 = arith.constant 9 : i32
    %50 = tpu.dynamic_rotate %0 by %c9_i32 dim 1 : vector<8x512xf32>, i32 -> vector<8x512xf32>
    %c9 = arith.constant 9 : index
    %c0_27 = arith.constant 0 : index
    %51 = vector.load %arg5[%c9, %c0_27] : memref<27x512xf32, #tpu.memory_space<vmem>>, vector<1x512xf32>
    %52 = vector.broadcast %51 : vector<1x512xf32> to vector<8x512xf32>
    %53 = arith.mulf %50, %52 : vector<8x512xf32>
    %c0_28 = arith.constant 0 : index
    %c0_29 = arith.constant 0 : index
    %54 = vector.load %arg7[%c0_28, %c0_29] : memref<72x512xf32, #tpu.memory_space<vmem>>, vector<8x512xf32>
    tpu.vector_store %arg7[%c0_28, %c0_29], %53 {strides = array<i32>} : memref<72x512xf32, #tpu.memory_space<vmem>>, vector<8x512xf32>,
    %c8_i32 = arith.constant 8 : i32
    %55 = tpu.dynamic_rotate %0 by %c8_i32 dim 1 : vector<8x512xf32>, i32 -> vector<8x512xf32>
    %c10 = arith.constant 10 : index
    %c0_30 = arith.constant 0 : index
    %56 = vector.load %arg5[%c10, %c0_30] : memref<27x512xf32, #tpu.memory_space<vmem>>, vector<1x512xf32>
    %57 = vector.broadcast %56 : vector<1x512xf32> to vector<8x512xf32>
    %58 = arith.mulf %55, %57 : vector<8x512xf32>
    %c8_31 = arith.constant 8 : index
    %c0_32 = arith.constant 0 : index
    %59 = vector.load %arg7[%c8_31, %c0_32] : memref<72x512xf32, #tpu.memory_space<vmem>>, vector<8x512xf32>
    tpu.vector_store %arg7[%c8_31, %c0_32], %58 {strides = array<i32>} : memref<72x512xf32, #tpu.memory_space<vmem>>, vector<8x512xf32>,
    %c7_i32 = arith.constant 7 : i32
    %60 = tpu.dynamic_rotate %0 by %c7_i32 dim 1 : vector<8x512xf32>, i32 -> vector<8x512xf32>
    %c11 = arith.constant 11 : index
    %c0_33 = arith.constant 0 : index
    %61 = vector.load %arg5[%c11, %c0_33] : memref<27x512xf32, #tpu.memory_space<vmem>>, vector<1x512xf32>
    %62 = vector.broadcast %61 : vector<1x512xf32> to vector<8x512xf32>
    %63 = arith.mulf %60, %62 : vector<8x512xf32>
    %c16_34 = arith.constant 16 : index
    %c0_35 = arith.constant 0 : index
    %64 = vector.load %arg7[%c16_34, %c0_35] : memref<72x512xf32, #tpu.memory_space<vmem>>, vector<8x512xf32>
    tpu.vector_store %arg7[%c16_34, %c0_35], %63 {strides = array<i32>} : memref<72x512xf32, #tpu.memory_space<vmem>>, vector<8x512xf32>,
    %c1_i32 = arith.constant 1 : i32
    %65 = tpu.dynamic_rotate %0 by %c1_i32 dim 1 : vector<8x512xf32>, i32 -> vector<8x512xf32>
    %c12 = arith.constant 12 : index
    %c0_36 = arith.constant 0 : index
    %66 = vector.load %arg5[%c12, %c0_36] : memref<27x512xf32, #tpu.memory_space<vmem>>, vector<1x512xf32>
    %67 = vector.broadcast %66 : vector<1x512xf32> to vector<8x512xf32>
    %68 = arith.mulf %65, %67 : vector<8x512xf32>
    %c24_37 = arith.constant 24 : index
    %c0_38 = arith.constant 0 : index
    %69 = vector.load %arg7[%c24_37, %c0_38] : memref<72x512xf32, #tpu.memory_space<vmem>>, vector<8x512xf32>
    tpu.vector_store %arg7[%c24_37, %c0_38], %68 {strides = array<i32>} : memref<72x512xf32, #tpu.memory_space<vmem>>, vector<8x512xf32>,
    %c0_i32 = arith.constant 0 : i32
    %70 = tpu.dynamic_rotate %0 by %c0_i32 dim 1 : vector<8x512xf32>, i32 -> vector<8x512xf32>
    %c13 = arith.constant 13 : index
    %c0_39 = arith.constant 0 : index
    %71 = vector.load %arg5[%c13, %c0_39] : memref<27x512xf32, #tpu.memory_space<vmem>>, vector<1x512xf32>
    %72 = vector.broadcast %71 : vector<1x512xf32> to vector<8x512xf32>
    %73 = arith.mulf %70, %72 : vector<8x512xf32>
    %c32_40 = arith.constant 32 : index
    %c0_41 = arith.constant 0 : index
    %74 = vector.load %arg7[%c32_40, %c0_41] : memref<72x512xf32, #tpu.memory_space<vmem>>, vector<8x512xf32>
    tpu.vector_store %arg7[%c32_40, %c0_41], %73 {strides = array<i32>} : memref<72x512xf32, #tpu.memory_space<vmem>>, vector<8x512xf32>,
    %c511_i32 = arith.constant 511 : i32
    %75 = tpu.dynamic_rotate %0 by %c511_i32 dim 1 : vector<8x512xf32>, i32 -> vector<8x512xf32>
    %c14 = arith.constant 14 : index
    %c0_42 = arith.constant 0 : index
    %76 = vector.load %arg5[%c14, %c0_42] : memref<27x512xf32, #tpu.memory_space<vmem>>, vector<1x512xf32>
    %77 = vector.broadcast %76 : vector<1x512xf32> to vector<8x512xf32>
    %78 = arith.mulf %75, %77 : vector<8x512xf32>
    %c40_43 = arith.constant 40 : index
    %c0_44 = arith.constant 0 : index
    %79 = vector.load %arg7[%c40_43, %c0_44] : memref<72x512xf32, #tpu.memory_space<vmem>>, vector<8x512xf32>
    tpu.vector_store %arg7[%c40_43, %c0_44], %78 {strides = array<i32>} : memref<72x512xf32, #tpu.memory_space<vmem>>, vector<8x512xf32>,
    %c505_i32 = arith.constant 505 : i32
    %80 = tpu.dynamic_rotate %0 by %c505_i32 dim 1 : vector<8x512xf32>, i32 -> vector<8x512xf32>
    %c15 = arith.constant 15 : index
    %c0_45 = arith.constant 0 : index
    %81 = vector.load %arg5[%c15, %c0_45] : memref<27x512xf32, #tpu.memory_space<vmem>>, vector<1x512xf32>
    %82 = vector.broadcast %81 : vector<1x512xf32> to vector<8x512xf32>
    %83 = arith.mulf %80, %82 : vector<8x512xf32>
    %c48_46 = arith.constant 48 : index
    %c0_47 = arith.constant 0 : index
    %84 = vector.load %arg7[%c48_46, %c0_47] : memref<72x512xf32, #tpu.memory_space<vmem>>, vector<8x512xf32>
    tpu.vector_store %arg7[%c48_46, %c0_47], %83 {strides = array<i32>} : memref<72x512xf32, #tpu.memory_space<vmem>>, vector<8x512xf32>,
    %c504_i32 = arith.constant 504 : i32
    %85 = tpu.dynamic_rotate %0 by %c504_i32 dim 1 : vector<8x512xf32>, i32 -> vector<8x512xf32>
    %c16_48 = arith.constant 16 : index
    %c0_49 = arith.constant 0 : index
    %86 = vector.load %arg5[%c16_48, %c0_49] : memref<27x512xf32, #tpu.memory_space<vmem>>, vector<1x512xf32>
    %87 = vector.broadcast %86 : vector<1x512xf32> to vector<8x512xf32>
    %88 = arith.mulf %85, %87 : vector<8x512xf32>
    %c56_50 = arith.constant 56 : index
    %c0_51 = arith.constant 0 : index
    %89 = vector.load %arg7[%c56_50, %c0_51] : memref<72x512xf32, #tpu.memory_space<vmem>>, vector<8x512xf32>
    tpu.vector_store %arg7[%c56_50, %c0_51], %88 {strides = array<i32>} : memref<72x512xf32, #tpu.memory_space<vmem>>, vector<8x512xf32>,
    %c503_i32 = arith.constant 503 : i32
    %90 = tpu.dynamic_rotate %0 by %c503_i32 dim 1 : vector<8x512xf32>, i32 -> vector<8x512xf32>
    %c17 = arith.constant 17 : index
    %c0_52 = arith.constant 0 : index
    %91 = vector.load %arg5[%c17, %c0_52] : memref<27x512xf32, #tpu.memory_space<vmem>>, vector<1x512xf32>
    %92 = vector.broadcast %91 : vector<1x512xf32> to vector<8x512xf32>
    %93 = arith.mulf %90, %92 : vector<8x512xf32>
    %c64_53 = arith.constant 64 : index
    %c0_54 = arith.constant 0 : index
    %94 = vector.load %arg7[%c64_53, %c0_54] : memref<72x512xf32, #tpu.memory_space<vmem>>, vector<8x512xf32>
    tpu.vector_store %arg7[%c64_53, %c0_54], %93 {strides = array<i32>} : memref<72x512xf32, #tpu.memory_space<vmem>>, vector<8x512xf32>,
    %c1_55 = arith.constant 1 : index
    %c0_56 = arith.constant 0 : index
    %c0_57 = arith.constant 0 : index
    %95 = vector.load %arg1[%c1_55, %c0_56, %c0_57] : memref<3x8x72xf32, #tpu.memory_space<vmem>>, vector<1x8x72xf32>
    %96 = vector.shape_cast %95 : vector<1x8x72xf32> to vector<8x72xf32>
    %c0_58 = arith.constant 0 : index
    %c0_59 = arith.constant 0 : index
    %97 = vector.load %arg7[%c0_58, %c0_59] : memref<72x512xf32, #tpu.memory_space<vmem>>, vector<72x512xf32>
    %cst_60 = arith.constant dense<0.000000e+00> : vector<8x512xf32>
    %98 = tpu.matmul %96, %97, %cst_60 {dimension_numbers = #tpu.dot_dimension_numbers<[1], [0], [0], [1], [0, 0, 1, 1], [], []>} : vector<8x72xf32>, vector<72x512xf32>, vector<8x512xf32> -> vector<8x512xf32>
    %99 = arith.addf %49, %98 : vector<8x512xf32>
    %c457_i32 = arith.constant 457 : i32
    %100 = tpu.dynamic_rotate %0 by %c457_i32 dim 1 : vector<8x512xf32>, i32 -> vector<8x512xf32>
    %c18 = arith.constant 18 : index
    %c0_61 = arith.constant 0 : index
    %101 = vector.load %arg5[%c18, %c0_61] : memref<27x512xf32, #tpu.memory_space<vmem>>, vector<1x512xf32>
    %102 = vector.broadcast %101 : vector<1x512xf32> to vector<8x512xf32>
    %103 = arith.mulf %100, %102 : vector<8x512xf32>
    %c0_62 = arith.constant 0 : index
    %c0_63 = arith.constant 0 : index
    %104 = vector.load %arg7[%c0_62, %c0_63] : memref<72x512xf32, #tpu.memory_space<vmem>>, vector<8x512xf32>
    tpu.vector_store %arg7[%c0_62, %c0_63], %103 {strides = array<i32>} : memref<72x512xf32, #tpu.memory_space<vmem>>, vector<8x512xf32>,
    %c456_i32 = arith.constant 456 : i32
    %105 = tpu.dynamic_rotate %0 by %c456_i32 dim 1 : vector<8x512xf32>, i32 -> vector<8x512xf32>
    %c19 = arith.constant 19 : index
    %c0_64 = arith.constant 0 : index
    %106 = vector.load %arg5[%c19, %c0_64] : memref<27x512xf32, #tpu.memory_space<vmem>>, vector<1x512xf32>
    %107 = vector.broadcast %106 : vector<1x512xf32> to vector<8x512xf32>
    %108 = arith.mulf %105, %107 : vector<8x512xf32>
    %c8_65 = arith.constant 8 : index
    %c0_66 = arith.constant 0 : index
    %109 = vector.load %arg7[%c8_65, %c0_66] : memref<72x512xf32, #tpu.memory_space<vmem>>, vector<8x512xf32>
    tpu.vector_store %arg7[%c8_65, %c0_66], %108 {strides = array<i32>} : memref<72x512xf32, #tpu.memory_space<vmem>>, vector<8x512xf32>,
    %c455_i32 = arith.constant 455 : i32
    %110 = tpu.dynamic_rotate %0 by %c455_i32 dim 1 : vector<8x512xf32>, i32 -> vector<8x512xf32>
    %c20 = arith.constant 20 : index
    %c0_67 = arith.constant 0 : index
    %111 = vector.load %arg5[%c20, %c0_67] : memref<27x512xf32, #tpu.memory_space<vmem>>, vector<1x512xf32>
    %112 = vector.broadcast %111 : vector<1x512xf32> to vector<8x512xf32>
    %113 = arith.mulf %110, %112 : vector<8x512xf32>
    %c16_68 = arith.constant 16 : index
    %c0_69 = arith.constant 0 : index
    %114 = vector.load %arg7[%c16_68, %c0_69] : memref<72x512xf32, #tpu.memory_space<vmem>>, vector<8x512xf32>
    tpu.vector_store %arg7[%c16_68, %c0_69], %113 {strides = array<i32>} : memref<72x512xf32, #tpu.memory_space<vmem>>, vector<8x512xf32>,
    %c449_i32 = arith.constant 449 : i32
    %115 = tpu.dynamic_rotate %0 by %c449_i32 dim 1 : vector<8x512xf32>, i32 -> vector<8x512xf32>
    %c21 = arith.constant 21 : index
    %c0_70 = arith.constant 0 : index
    %116 = vector.load %arg5[%c21, %c0_70] : memref<27x512xf32, #tpu.memory_space<vmem>>, vector<1x512xf32>
    %117 = vector.broadcast %116 : vector<1x512xf32> to vector<8x512xf32>
    %118 = arith.mulf %115, %117 : vector<8x512xf32>
    %c24_71 = arith.constant 24 : index
    %c0_72 = arith.constant 0 : index
    %119 = vector.load %arg7[%c24_71, %c0_72] : memref<72x512xf32, #tpu.memory_space<vmem>>, vector<8x512xf32>
    tpu.vector_store %arg7[%c24_71, %c0_72], %118 {strides = array<i32>} : memref<72x512xf32, #tpu.memory_space<vmem>>, vector<8x512xf32>,
    %c448_i32 = arith.constant 448 : i32
    %120 = tpu.dynamic_rotate %0 by %c448_i32 dim 1 : vector<8x512xf32>, i32 -> vector<8x512xf32>
    %c22 = arith.constant 22 : index
    %c0_73 = arith.constant 0 : index
    %121 = vector.load %arg5[%c22, %c0_73] : memref<27x512xf32, #tpu.memory_space<vmem>>, vector<1x512xf32>
    %122 = vector.broadcast %121 : vector<1x512xf32> to vector<8x512xf32>
    %123 = arith.mulf %120, %122 : vector<8x512xf32>
    %c32_74 = arith.constant 32 : index
    %c0_75 = arith.constant 0 : index
    %124 = vector.load %arg7[%c32_74, %c0_75] : memref<72x512xf32, #tpu.memory_space<vmem>>, vector<8x512xf32>
    tpu.vector_store %arg7[%c32_74, %c0_75], %123 {strides = array<i32>} : memref<72x512xf32, #tpu.memory_space<vmem>>, vector<8x512xf32>,
    %c447_i32 = arith.constant 447 : i32
    %125 = tpu.dynamic_rotate %0 by %c447_i32 dim 1 : vector<8x512xf32>, i32 -> vector<8x512xf32>
    %c23 = arith.constant 23 : index
    %c0_76 = arith.constant 0 : index
    %126 = vector.load %arg5[%c23, %c0_76] : memref<27x512xf32, #tpu.memory_space<vmem>>, vector<1x512xf32>
    %127 = vector.broadcast %126 : vector<1x512xf32> to vector<8x512xf32>
    %128 = arith.mulf %125, %127 : vector<8x512xf32>
    %c40_77 = arith.constant 40 : index
    %c0_78 = arith.constant 0 : index
    %129 = vector.load %arg7[%c40_77, %c0_78] : memref<72x512xf32, #tpu.memory_space<vmem>>, vector<8x512xf32>
    tpu.vector_store %arg7[%c40_77, %c0_78], %128 {strides = array<i32>} : memref<72x512xf32, #tpu.memory_space<vmem>>, vector<8x512xf32>,
    %c441_i32 = arith.constant 441 : i32
    %130 = tpu.dynamic_rotate %0 by %c441_i32 dim 1 : vector<8x512xf32>, i32 -> vector<8x512xf32>
    %c24_79 = arith.constant 24 : index
    %c0_80 = arith.constant 0 : index
    %131 = vector.load %arg5[%c24_79, %c0_80] : memref<27x512xf32, #tpu.memory_space<vmem>>, vector<1x512xf32>
    %132 = vector.broadcast %131 : vector<1x512xf32> to vector<8x512xf32>
    %133 = arith.mulf %130, %132 : vector<8x512xf32>
    %c48_81 = arith.constant 48 : index
    %c0_82 = arith.constant 0 : index
    %134 = vector.load %arg7[%c48_81, %c0_82] : memref<72x512xf32, #tpu.memory_space<vmem>>, vector<8x512xf32>
    tpu.vector_store %arg7[%c48_81, %c0_82], %133 {strides = array<i32>} : memref<72x512xf32, #tpu.memory_space<vmem>>, vector<8x512xf32>,
    %c440_i32 = arith.constant 440 : i32
    %135 = tpu.dynamic_rotate %0 by %c440_i32 dim 1 : vector<8x512xf32>, i32 -> vector<8x512xf32>
    %c25 = arith.constant 25 : index
    %c0_83 = arith.constant 0 : index
    %136 = vector.load %arg5[%c25, %c0_83] : memref<27x512xf32, #tpu.memory_space<vmem>>, vector<1x512xf32>
    %137 = vector.broadcast %136 : vector<1x512xf32> to vector<8x512xf32>
    %138 = arith.mulf %135, %137 : vector<8x512xf32>
    %c56_84 = arith.constant 56 : index
    %c0_85 = arith.constant 0 : index
    %139 = vector.load %arg7[%c56_84, %c0_85] : memref<72x512xf32, #tpu.memory_space<vmem>>, vector<8x512xf32>
    tpu.vector_store %arg7[%c56_84, %c0_85], %138 {strides = array<i32>} : memref<72x512xf32, #tpu.memory_space<vmem>>, vector<8x512xf32>,
    %c439_i32 = arith.constant 439 : i32
    %140 = tpu.dynamic_rotate %0 by %c439_i32 dim 1 : vector<8x512xf32>, i32 -> vector<8x512xf32>
    %c26 = arith.constant 26 : index
    %c0_86 = arith.constant 0 : index
    %141 = vector.load %arg5[%c26, %c0_86] : memref<27x512xf32, #tpu.memory_space<vmem>>, vector<1x512xf32>
    %142 = vector.broadcast %141 : vector<1x512xf32> to vector<8x512xf32>
    %143 = arith.mulf %140, %142 : vector<8x512xf32>
    %c64_87 = arith.constant 64 : index
    %c0_88 = arith.constant 0 : index
    %144 = vector.load %arg7[%c64_87, %c0_88] : memref<72x512xf32, #tpu.memory_space<vmem>>, vector<8x512xf32>
    tpu.vector_store %arg7[%c64_87, %c0_88], %143 {strides = array<i32>} : memref<72x512xf32, #tpu.memory_space<vmem>>, vector<8x512xf32>,
    %c2_89 = arith.constant 2 : index
    %c0_90 = arith.constant 0 : index
    %c0_91 = arith.constant 0 : index
    %145 = vector.load %arg1[%c2_89, %c0_90, %c0_91] : memref<3x8x72xf32, #tpu.memory_space<vmem>>, vector<1x8x72xf32>
    %146 = vector.shape_cast %145 : vector<1x8x72xf32> to vector<8x72xf32>
    %c0_92 = arith.constant 0 : index
    %c0_93 = arith.constant 0 : index
    %147 = vector.load %arg7[%c0_92, %c0_93] : memref<72x512xf32, #tpu.memory_space<vmem>>, vector<72x512xf32>
    %cst_94 = arith.constant dense<0.000000e+00> : vector<8x512xf32>
    %148 = tpu.matmul %146, %147, %cst_94 {dimension_numbers = #tpu.dot_dimension_numbers<[1], [0], [0], [1], [0, 0, 1, 1], [], []>} : vector<8x72xf32>, vector<72x512xf32>, vector<8x512xf32> -> vector<8x512xf32>
    %149 = arith.addf %99, %148 : vector<8x512xf32>
    %c0_95 = arith.constant 0 : index
    %c0_96 = arith.constant 0 : index
    %150 = vector.load %arg2[%c0_95, %c0_96] : memref<8x1xf32, #tpu.memory_space<vmem>>, vector<8x1xf32>
    %151 = vector.broadcast %150 : vector<8x1xf32> to vector<8x512xf32>
    %152 = arith.addf %149, %151 : vector<8x512xf32>
    %cst_97 = arith.constant 0.000000e+00 : f32
    %153 = vector.broadcast %cst_97 : f32 to vector<8x512xf32>
    %154 = arith.maximumf %152, %153 : vector<8x512xf32>
    %c73_i32_98 = arith.constant 73 : i32
    %155 = tpu.dynamic_rotate %154 by %c73_i32_98 dim 1 : vector<8x512xf32>, i32 -> vector<8x512xf32>
    %c0_99 = arith.constant 0 : index
    %c0_100 = arith.constant 0 : index
    %156 = vector.load %arg5[%c0_99, %c0_100] : memref<27x512xf32, #tpu.memory_space<vmem>>, vector<1x512xf32>
    %157 = vector.broadcast %156 : vector<1x512xf32> to vector<8x512xf32>
    %158 = arith.mulf %155, %157 : vector<8x512xf32>
    %c0_101 = arith.constant 0 : index
    %c0_102 = arith.constant 0 : index
    %159 = vector.load %arg7[%c0_101, %c0_102] : memref<72x512xf32, #tpu.memory_space<vmem>>, vector<8x512xf32>
    tpu.vector_store %arg7[%c0_101, %c0_102], %158 {strides = array<i32>} : memref<72x512xf32, #tpu.memory_space<vmem>>, vector<8x512xf32>,
    %c72_i32_103 = arith.constant 72 : i32
    %160 = tpu.dynamic_rotate %154 by %c72_i32_103 dim 1 : vector<8x512xf32>, i32 -> vector<8x512xf32>
    %c1_104 = arith.constant 1 : index
    %c0_105 = arith.constant 0 : index
    %161 = vector.load %arg5[%c1_104, %c0_105] : memref<27x512xf32, #tpu.memory_space<vmem>>, vector<1x512xf32>
    %162 = vector.broadcast %161 : vector<1x512xf32> to vector<8x512xf32>
    %163 = arith.mulf %160, %162 : vector<8x512xf32>
    %c8_106 = arith.constant 8 : index
    %c0_107 = arith.constant 0 : index
    %164 = vector.load %arg7[%c8_106, %c0_107] : memref<72x512xf32, #tpu.memory_space<vmem>>, vector<8x512xf32>
    tpu.vector_store %arg7[%c8_106, %c0_107], %163 {strides = array<i32>} : memref<72x512xf32, #tpu.memory_space<vmem>>, vector<8x512xf32>,
    %c71_i32_108 = arith.constant 71 : i32
    %165 = tpu.dynamic_rotate %154 by %c71_i32_108 dim 1 : vector<8x512xf32>, i32 -> vector<8x512xf32>
    %c2_109 = arith.constant 2 : index
    %c0_110 = arith.constant 0 : index
    %166 = vector.load %arg5[%c2_109, %c0_110] : memref<27x512xf32, #tpu.memory_space<vmem>>, vector<1x512xf32>
    %167 = vector.broadcast %166 : vector<1x512xf32> to vector<8x512xf32>
    %168 = arith.mulf %165, %167 : vector<8x512xf32>
    %c16_111 = arith.constant 16 : index
    %c0_112 = arith.constant 0 : index
    %169 = vector.load %arg7[%c16_111, %c0_112] : memref<72x512xf32, #tpu.memory_space<vmem>>, vector<8x512xf32>
    tpu.vector_store %arg7[%c16_111, %c0_112], %168 {strides = array<i32>} : memref<72x512xf32, #tpu.memory_space<vmem>>, vector<8x512xf32>,
    %c65_i32_113 = arith.constant 65 : i32
    %170 = tpu.dynamic_rotate %154 by %c65_i32_113 dim 1 : vector<8x512xf32>, i32 -> vector<8x512xf32>
    %c3_114 = arith.constant 3 : index
    %c0_115 = arith.constant 0 : index
    %171 = vector.load %arg5[%c3_114, %c0_115] : memref<27x512xf32, #tpu.memory_space<vmem>>, vector<1x512xf32>
    %172 = vector.broadcast %171 : vector<1x512xf32> to vector<8x512xf32>
    %173 = arith.mulf %170, %172 : vector<8x512xf32>
    %c24_116 = arith.constant 24 : index
    %c0_117 = arith.constant 0 : index
    %174 = vector.load %arg7[%c24_116, %c0_117] : memref<72x512xf32, #tpu.memory_space<vmem>>, vector<8x512xf32>
    tpu.vector_store %arg7[%c24_116, %c0_117], %173 {strides = array<i32>} : memref<72x512xf32, #tpu.memory_space<vmem>>, vector<8x512xf32>,
    %c64_i32_118 = arith.constant 64 : i32
    %175 = tpu.dynamic_rotate %154 by %c64_i32_118 dim 1 : vector<8x512xf32>, i32 -> vector<8x512xf32>
    %c4_119 = arith.constant 4 : index
    %c0_120 = arith.constant 0 : index
    %176 = vector.load %arg5[%c4_119, %c0_120] : memref<27x512xf32, #tpu.memory_space<vmem>>, vector<1x512xf32>
    %177 = vector.broadcast %176 : vector<1x512xf32> to vector<8x512xf32>
    %178 = arith.mulf %175, %177 : vector<8x512xf32>
    %c32_121 = arith.constant 32 : index
    %c0_122 = arith.constant 0 : index
    %179 = vector.load %arg7[%c32_121, %c0_122] : memref<72x512xf32, #tpu.memory_space<vmem>>, vector<8x512xf32>
    tpu.vector_store %arg7[%c32_121, %c0_122], %178 {strides = array<i32>} : memref<72x512xf32, #tpu.memory_space<vmem>>, vector<8x512xf32>,
    %c63_i32_123 = arith.constant 63 : i32
    %180 = tpu.dynamic_rotate %154 by %c63_i32_123 dim 1 : vector<8x512xf32>, i32 -> vector<8x512xf32>
    %c5_124 = arith.constant 5 : index
    %c0_125 = arith.constant 0 : index
    %181 = vector.load %arg5[%c5_124, %c0_125] : memref<27x512xf32, #tpu.memory_space<vmem>>, vector<1x512xf32>
    %182 = vector.broadcast %181 : vector<1x512xf32> to vector<8x512xf32>
    %183 = arith.mulf %180, %182 : vector<8x512xf32>
    %c40_126 = arith.constant 40 : index
    %c0_127 = arith.constant 0 : index
    %184 = vector.load %arg7[%c40_126, %c0_127] : memref<72x512xf32, #tpu.memory_space<vmem>>, vector<8x512xf32>
    tpu.vector_store %arg7[%c40_126, %c0_127], %183 {strides = array<i32>} : memref<72x512xf32, #tpu.memory_space<vmem>>, vector<8x512xf32>,
    %c57_i32_128 = arith.constant 57 : i32
    %185 = tpu.dynamic_rotate %154 by %c57_i32_128 dim 1 : vector<8x512xf32>, i32 -> vector<8x512xf32>
    %c6_129 = arith.constant 6 : index
    %c0_130 = arith.constant 0 : index
    %186 = vector.load %arg5[%c6_129, %c0_130] : memref<27x512xf32, #tpu.memory_space<vmem>>, vector<1x512xf32>
    %187 = vector.broadcast %186 : vector<1x512xf32> to vector<8x512xf32>
    %188 = arith.mulf %185, %187 : vector<8x512xf32>
    %c48_131 = arith.constant 48 : index
    %c0_132 = arith.constant 0 : index
    %189 = vector.load %arg7[%c48_131, %c0_132] : memref<72x512xf32, #tpu.memory_space<vmem>>, vector<8x512xf32>
    tpu.vector_store %arg7[%c48_131, %c0_132], %188 {strides = array<i32>} : memref<72x512xf32, #tpu.memory_space<vmem>>, vector<8x512xf32>,
    %c56_i32_133 = arith.constant 56 : i32
    %190 = tpu.dynamic_rotate %154 by %c56_i32_133 dim 1 : vector<8x512xf32>, i32 -> vector<8x512xf32>
    %c7_134 = arith.constant 7 : index
    %c0_135 = arith.constant 0 : index
    %191 = vector.load %arg5[%c7_134, %c0_135] : memref<27x512xf32, #tpu.memory_space<vmem>>, vector<1x512xf32>
    %192 = vector.broadcast %191 : vector<1x512xf32> to vector<8x512xf32>
    %193 = arith.mulf %190, %192 : vector<8x512xf32>
    %c56_136 = arith.constant 56 : index
    %c0_137 = arith.constant 0 : index
    %194 = vector.load %arg7[%c56_136, %c0_137] : memref<72x512xf32, #tpu.memory_space<vmem>>, vector<8x512xf32>
    tpu.vector_store %arg7[%c56_136, %c0_137], %193 {strides = array<i32>} : memref<72x512xf32, #tpu.memory_space<vmem>>, vector<8x512xf32>,
    %c55_i32_138 = arith.constant 55 : i32
    %195 = tpu.dynamic_rotate %154 by %c55_i32_138 dim 1 : vector<8x512xf32>, i32 -> vector<8x512xf32>
    %c8_139 = arith.constant 8 : index
    %c0_140 = arith.constant 0 : index
    %196 = vector.load %arg5[%c8_139, %c0_140] : memref<27x512xf32, #tpu.memory_space<vmem>>, vector<1x512xf32>
    %197 = vector.broadcast %196 : vector<1x512xf32> to vector<8x512xf32>
    %198 = arith.mulf %195, %197 : vector<8x512xf32>
    %c64_141 = arith.constant 64 : index
    %c0_142 = arith.constant 0 : index
    %199 = vector.load %arg7[%c64_141, %c0_142] : memref<72x512xf32, #tpu.memory_space<vmem>>, vector<8x512xf32>
    tpu.vector_store %arg7[%c64_141, %c0_142], %198 {strides = array<i32>} : memref<72x512xf32, #tpu.memory_space<vmem>>, vector<8x512xf32>,
    %c0_143 = arith.constant 0 : index
    %c0_144 = arith.constant 0 : index
    %c0_145 = arith.constant 0 : index
    %200 = vector.load %arg3[%c0_143, %c0_144, %c0_145] : memref<3x8x72xf32, #tpu.memory_space<vmem>>, vector<1x8x72xf32>
    %201 = vector.shape_cast %200 : vector<1x8x72xf32> to vector<8x72xf32>
    %c0_146 = arith.constant 0 : index
    %c0_147 = arith.constant 0 : index
    %202 = vector.load %arg7[%c0_146, %c0_147] : memref<72x512xf32, #tpu.memory_space<vmem>>, vector<72x512xf32>
    %cst_148 = arith.constant dense<0.000000e+00> : vector<8x512xf32>
    %203 = tpu.matmul %201, %202, %cst_148 {dimension_numbers = #tpu.dot_dimension_numbers<[1], [0], [0], [1], [0, 0, 1, 1], [], []>} : vector<8x72xf32>, vector<72x512xf32>, vector<8x512xf32> -> vector<8x512xf32>
    %c9_i32_149 = arith.constant 9 : i32
    %204 = tpu.dynamic_rotate %154 by %c9_i32_149 dim 1 : vector<8x512xf32>, i32 -> vector<8x512xf32>
    %c9_150 = arith.constant 9 : index
    %c0_151 = arith.constant 0 : index
    %205 = vector.load %arg5[%c9_150, %c0_151] : memref<27x512xf32, #tpu.memory_space<vmem>>, vector<1x512xf32>
    %206 = vector.broadcast %205 : vector<1x512xf32> to vector<8x512xf32>
    %207 = arith.mulf %204, %206 : vector<8x512xf32>
    %c0_152 = arith.constant 0 : index
    %c0_153 = arith.constant 0 : index
    %208 = vector.load %arg7[%c0_152, %c0_153] : memref<72x512xf32, #tpu.memory_space<vmem>>, vector<8x512xf32>
    tpu.vector_store %arg7[%c0_152, %c0_153], %207 {strides = array<i32>} : memref<72x512xf32, #tpu.memory_space<vmem>>, vector<8x512xf32>,
    %c8_i32_154 = arith.constant 8 : i32
    %209 = tpu.dynamic_rotate %154 by %c8_i32_154 dim 1 : vector<8x512xf32>, i32 -> vector<8x512xf32>
    %c10_155 = arith.constant 10 : index
    %c0_156 = arith.constant 0 : index
    %210 = vector.load %arg5[%c10_155, %c0_156] : memref<27x512xf32, #tpu.memory_space<vmem>>, vector<1x512xf32>
    %211 = vector.broadcast %210 : vector<1x512xf32> to vector<8x512xf32>
    %212 = arith.mulf %209, %211 : vector<8x512xf32>
    %c8_157 = arith.constant 8 : index
    %c0_158 = arith.constant 0 : index
    %213 = vector.load %arg7[%c8_157, %c0_158] : memref<72x512xf32, #tpu.memory_space<vmem>>, vector<8x512xf32>
    tpu.vector_store %arg7[%c8_157, %c0_158], %212 {strides = array<i32>} : memref<72x512xf32, #tpu.memory_space<vmem>>, vector<8x512xf32>,
    %c7_i32_159 = arith.constant 7 : i32
    %214 = tpu.dynamic_rotate %154 by %c7_i32_159 dim 1 : vector<8x512xf32>, i32 -> vector<8x512xf32>
    %c11_160 = arith.constant 11 : index
    %c0_161 = arith.constant 0 : index
    %215 = vector.load %arg5[%c11_160, %c0_161] : memref<27x512xf32, #tpu.memory_space<vmem>>, vector<1x512xf32>
    %216 = vector.broadcast %215 : vector<1x512xf32> to vector<8x512xf32>
    %217 = arith.mulf %214, %216 : vector<8x512xf32>
    %c16_162 = arith.constant 16 : index
    %c0_163 = arith.constant 0 : index
    %218 = vector.load %arg7[%c16_162, %c0_163] : memref<72x512xf32, #tpu.memory_space<vmem>>, vector<8x512xf32>
    tpu.vector_store %arg7[%c16_162, %c0_163], %217 {strides = array<i32>} : memref<72x512xf32, #tpu.memory_space<vmem>>, vector<8x512xf32>,
    %c1_i32_164 = arith.constant 1 : i32
    %219 = tpu.dynamic_rotate %154 by %c1_i32_164 dim 1 : vector<8x512xf32>, i32 -> vector<8x512xf32>
    %c12_165 = arith.constant 12 : index
    %c0_166 = arith.constant 0 : index
    %220 = vector.load %arg5[%c12_165, %c0_166] : memref<27x512xf32, #tpu.memory_space<vmem>>, vector<1x512xf32>
    %221 = vector.broadcast %220 : vector<1x512xf32> to vector<8x512xf32>
    %222 = arith.mulf %219, %221 : vector<8x512xf32>
    %c24_167 = arith.constant 24 : index
    %c0_168 = arith.constant 0 : index
    %223 = vector.load %arg7[%c24_167, %c0_168] : memref<72x512xf32, #tpu.memory_space<vmem>>, vector<8x512xf32>
    tpu.vector_store %arg7[%c24_167, %c0_168], %222 {strides = array<i32>} : memref<72x512xf32, #tpu.memory_space<vmem>>, vector<8x512xf32>,
    %c0_i32_169 = arith.constant 0 : i32
    %224 = tpu.dynamic_rotate %154 by %c0_i32_169 dim 1 : vector<8x512xf32>, i32 -> vector<8x512xf32>
    %c13_170 = arith.constant 13 : index
    %c0_171 = arith.constant 0 : index
    %225 = vector.load %arg5[%c13_170, %c0_171] : memref<27x512xf32, #tpu.memory_space<vmem>>, vector<1x512xf32>
    %226 = vector.broadcast %225 : vector<1x512xf32> to vector<8x512xf32>
    %227 = arith.mulf %224, %226 : vector<8x512xf32>
    %c32_172 = arith.constant 32 : index
    %c0_173 = arith.constant 0 : index
    %228 = vector.load %arg7[%c32_172, %c0_173] : memref<72x512xf32, #tpu.memory_space<vmem>>, vector<8x512xf32>
    tpu.vector_store %arg7[%c32_172, %c0_173], %227 {strides = array<i32>} : memref<72x512xf32, #tpu.memory_space<vmem>>, vector<8x512xf32>,
    %c511_i32_174 = arith.constant 511 : i32
    %229 = tpu.dynamic_rotate %154 by %c511_i32_174 dim 1 : vector<8x512xf32>, i32 -> vector<8x512xf32>
    %c14_175 = arith.constant 14 : index
    %c0_176 = arith.constant 0 : index
    %230 = vector.load %arg5[%c14_175, %c0_176] : memref<27x512xf32, #tpu.memory_space<vmem>>, vector<1x512xf32>
    %231 = vector.broadcast %230 : vector<1x512xf32> to vector<8x512xf32>
    %232 = arith.mulf %229, %231 : vector<8x512xf32>
    %c40_177 = arith.constant 40 : index
    %c0_178 = arith.constant 0 : index
    %233 = vector.load %arg7[%c40_177, %c0_178] : memref<72x512xf32, #tpu.memory_space<vmem>>, vector<8x512xf32>
    tpu.vector_store %arg7[%c40_177, %c0_178], %232 {strides = array<i32>} : memref<72x512xf32, #tpu.memory_space<vmem>>, vector<8x512xf32>,
    %c505_i32_179 = arith.constant 505 : i32
    %234 = tpu.dynamic_rotate %154 by %c505_i32_179 dim 1 : vector<8x512xf32>, i32 -> vector<8x512xf32>
    %c15_180 = arith.constant 15 : index
    %c0_181 = arith.constant 0 : index
    %235 = vector.load %arg5[%c15_180, %c0_181] : memref<27x512xf32, #tpu.memory_space<vmem>>, vector<1x512xf32>
    %236 = vector.broadcast %235 : vector<1x512xf32> to vector<8x512xf32>
    %237 = arith.mulf %234, %236 : vector<8x512xf32>
    %c48_182 = arith.constant 48 : index
    %c0_183 = arith.constant 0 : index
    %238 = vector.load %arg7[%c48_182, %c0_183] : memref<72x512xf32, #tpu.memory_space<vmem>>, vector<8x512xf32>
    tpu.vector_store %arg7[%c48_182, %c0_183], %237 {strides = array<i32>} : memref<72x512xf32, #tpu.memory_space<vmem>>, vector<8x512xf32>,
    %c504_i32_184 = arith.constant 504 : i32
    %239 = tpu.dynamic_rotate %154 by %c504_i32_184 dim 1 : vector<8x512xf32>, i32 -> vector<8x512xf32>
    %c16_185 = arith.constant 16 : index
    %c0_186 = arith.constant 0 : index
    %240 = vector.load %arg5[%c16_185, %c0_186] : memref<27x512xf32, #tpu.memory_space<vmem>>, vector<1x512xf32>
    %241 = vector.broadcast %240 : vector<1x512xf32> to vector<8x512xf32>
    %242 = arith.mulf %239, %241 : vector<8x512xf32>
    %c56_187 = arith.constant 56 : index
    %c0_188 = arith.constant 0 : index
    %243 = vector.load %arg7[%c56_187, %c0_188] : memref<72x512xf32, #tpu.memory_space<vmem>>, vector<8x512xf32>
    tpu.vector_store %arg7[%c56_187, %c0_188], %242 {strides = array<i32>} : memref<72x512xf32, #tpu.memory_space<vmem>>, vector<8x512xf32>,
    %c503_i32_189 = arith.constant 503 : i32
    %244 = tpu.dynamic_rotate %154 by %c503_i32_189 dim 1 : vector<8x512xf32>, i32 -> vector<8x512xf32>
    %c17_190 = arith.constant 17 : index
    %c0_191 = arith.constant 0 : index
    %245 = vector.load %arg5[%c17_190, %c0_191] : memref<27x512xf32, #tpu.memory_space<vmem>>, vector<1x512xf32>
    %246 = vector.broadcast %245 : vector<1x512xf32> to vector<8x512xf32>
    %247 = arith.mulf %244, %246 : vector<8x512xf32>
    %c64_192 = arith.constant 64 : index
    %c0_193 = arith.constant 0 : index
    %248 = vector.load %arg7[%c64_192, %c0_193] : memref<72x512xf32, #tpu.memory_space<vmem>>, vector<8x512xf32>
    tpu.vector_store %arg7[%c64_192, %c0_193], %247 {strides = array<i32>} : memref<72x512xf32, #tpu.memory_space<vmem>>, vector<8x512xf32>,
    %c1_194 = arith.constant 1 : index
    %c0_195 = arith.constant 0 : index
    %c0_196 = arith.constant 0 : index
    %249 = vector.load %arg3[%c1_194, %c0_195, %c0_196] : memref<3x8x72xf32, #tpu.memory_space<vmem>>, vector<1x8x72xf32>
    %250 = vector.shape_cast %249 : vector<1x8x72xf32> to vector<8x72xf32>
    %c0_197 = arith.constant 0 : index
    %c0_198 = arith.constant 0 : index
    %251 = vector.load %arg7[%c0_197, %c0_198] : memref<72x512xf32, #tpu.memory_space<vmem>>, vector<72x512xf32>
    %cst_199 = arith.constant dense<0.000000e+00> : vector<8x512xf32>
    %252 = tpu.matmul %250, %251, %cst_199 {dimension_numbers = #tpu.dot_dimension_numbers<[1], [0], [0], [1], [0, 0, 1, 1], [], []>} : vector<8x72xf32>, vector<72x512xf32>, vector<8x512xf32> -> vector<8x512xf32>
    %253 = arith.addf %203, %252 : vector<8x512xf32>
    %c457_i32_200 = arith.constant 457 : i32
    %254 = tpu.dynamic_rotate %154 by %c457_i32_200 dim 1 : vector<8x512xf32>, i32 -> vector<8x512xf32>
    %c18_201 = arith.constant 18 : index
    %c0_202 = arith.constant 0 : index
    %255 = vector.load %arg5[%c18_201, %c0_202] : memref<27x512xf32, #tpu.memory_space<vmem>>, vector<1x512xf32>
    %256 = vector.broadcast %255 : vector<1x512xf32> to vector<8x512xf32>
    %257 = arith.mulf %254, %256 : vector<8x512xf32>
    %c0_203 = arith.constant 0 : index
    %c0_204 = arith.constant 0 : index
    %258 = vector.load %arg7[%c0_203, %c0_204] : memref<72x512xf32, #tpu.memory_space<vmem>>, vector<8x512xf32>
    tpu.vector_store %arg7[%c0_203, %c0_204], %257 {strides = array<i32>} : memref<72x512xf32, #tpu.memory_space<vmem>>, vector<8x512xf32>,
    %c456_i32_205 = arith.constant 456 : i32
    %259 = tpu.dynamic_rotate %154 by %c456_i32_205 dim 1 : vector<8x512xf32>, i32 -> vector<8x512xf32>
    %c19_206 = arith.constant 19 : index
    %c0_207 = arith.constant 0 : index
    %260 = vector.load %arg5[%c19_206, %c0_207] : memref<27x512xf32, #tpu.memory_space<vmem>>, vector<1x512xf32>
    %261 = vector.broadcast %260 : vector<1x512xf32> to vector<8x512xf32>
    %262 = arith.mulf %259, %261 : vector<8x512xf32>
    %c8_208 = arith.constant 8 : index
    %c0_209 = arith.constant 0 : index
    %263 = vector.load %arg7[%c8_208, %c0_209] : memref<72x512xf32, #tpu.memory_space<vmem>>, vector<8x512xf32>
    tpu.vector_store %arg7[%c8_208, %c0_209], %262 {strides = array<i32>} : memref<72x512xf32, #tpu.memory_space<vmem>>, vector<8x512xf32>,
    %c455_i32_210 = arith.constant 455 : i32
    %264 = tpu.dynamic_rotate %154 by %c455_i32_210 dim 1 : vector<8x512xf32>, i32 -> vector<8x512xf32>
    %c20_211 = arith.constant 20 : index
    %c0_212 = arith.constant 0 : index
    %265 = vector.load %arg5[%c20_211, %c0_212] : memref<27x512xf32, #tpu.memory_space<vmem>>, vector<1x512xf32>
    %266 = vector.broadcast %265 : vector<1x512xf32> to vector<8x512xf32>
    %267 = arith.mulf %264, %266 : vector<8x512xf32>
    %c16_213 = arith.constant 16 : index
    %c0_214 = arith.constant 0 : index
    %268 = vector.load %arg7[%c16_213, %c0_214] : memref<72x512xf32, #tpu.memory_space<vmem>>, vector<8x512xf32>
    tpu.vector_store %arg7[%c16_213, %c0_214], %267 {strides = array<i32>} : memref<72x512xf32, #tpu.memory_space<vmem>>, vector<8x512xf32>,
    %c449_i32_215 = arith.constant 449 : i32
    %269 = tpu.dynamic_rotate %154 by %c449_i32_215 dim 1 : vector<8x512xf32>, i32 -> vector<8x512xf32>
    %c21_216 = arith.constant 21 : index
    %c0_217 = arith.constant 0 : index
    %270 = vector.load %arg5[%c21_216, %c0_217] : memref<27x512xf32, #tpu.memory_space<vmem>>, vector<1x512xf32>
    %271 = vector.broadcast %270 : vector<1x512xf32> to vector<8x512xf32>
    %272 = arith.mulf %269, %271 : vector<8x512xf32>
    %c24_218 = arith.constant 24 : index
    %c0_219 = arith.constant 0 : index
    %273 = vector.load %arg7[%c24_218, %c0_219] : memref<72x512xf32, #tpu.memory_space<vmem>>, vector<8x512xf32>
    tpu.vector_store %arg7[%c24_218, %c0_219], %272 {strides = array<i32>} : memref<72x512xf32, #tpu.memory_space<vmem>>, vector<8x512xf32>,
    %c448_i32_220 = arith.constant 448 : i32
    %274 = tpu.dynamic_rotate %154 by %c448_i32_220 dim 1 : vector<8x512xf32>, i32 -> vector<8x512xf32>
    %c22_221 = arith.constant 22 : index
    %c0_222 = arith.constant 0 : index
    %275 = vector.load %arg5[%c22_221, %c0_222] : memref<27x512xf32, #tpu.memory_space<vmem>>, vector<1x512xf32>
    %276 = vector.broadcast %275 : vector<1x512xf32> to vector<8x512xf32>
    %277 = arith.mulf %274, %276 : vector<8x512xf32>
    %c32_223 = arith.constant 32 : index
    %c0_224 = arith.constant 0 : index
    %278 = vector.load %arg7[%c32_223, %c0_224] : memref<72x512xf32, #tpu.memory_space<vmem>>, vector<8x512xf32>
    tpu.vector_store %arg7[%c32_223, %c0_224], %277 {strides = array<i32>} : memref<72x512xf32, #tpu.memory_space<vmem>>, vector<8x512xf32>,
    %c447_i32_225 = arith.constant 447 : i32
    %279 = tpu.dynamic_rotate %154 by %c447_i32_225 dim 1 : vector<8x512xf32>, i32 -> vector<8x512xf32>
    %c23_226 = arith.constant 23 : index
    %c0_227 = arith.constant 0 : index
    %280 = vector.load %arg5[%c23_226, %c0_227] : memref<27x512xf32, #tpu.memory_space<vmem>>, vector<1x512xf32>
    %281 = vector.broadcast %280 : vector<1x512xf32> to vector<8x512xf32>
    %282 = arith.mulf %279, %281 : vector<8x512xf32>
    %c40_228 = arith.constant 40 : index
    %c0_229 = arith.constant 0 : index
    %283 = vector.load %arg7[%c40_228, %c0_229] : memref<72x512xf32, #tpu.memory_space<vmem>>, vector<8x512xf32>
    tpu.vector_store %arg7[%c40_228, %c0_229], %282 {strides = array<i32>} : memref<72x512xf32, #tpu.memory_space<vmem>>, vector<8x512xf32>,
    %c441_i32_230 = arith.constant 441 : i32
    %284 = tpu.dynamic_rotate %154 by %c441_i32_230 dim 1 : vector<8x512xf32>, i32 -> vector<8x512xf32>
    %c24_231 = arith.constant 24 : index
    %c0_232 = arith.constant 0 : index
    %285 = vector.load %arg5[%c24_231, %c0_232] : memref<27x512xf32, #tpu.memory_space<vmem>>, vector<1x512xf32>
    %286 = vector.broadcast %285 : vector<1x512xf32> to vector<8x512xf32>
    %287 = arith.mulf %284, %286 : vector<8x512xf32>
    %c48_233 = arith.constant 48 : index
    %c0_234 = arith.constant 0 : index
    %288 = vector.load %arg7[%c48_233, %c0_234] : memref<72x512xf32, #tpu.memory_space<vmem>>, vector<8x512xf32>
    tpu.vector_store %arg7[%c48_233, %c0_234], %287 {strides = array<i32>} : memref<72x512xf32, #tpu.memory_space<vmem>>, vector<8x512xf32>,
    %c440_i32_235 = arith.constant 440 : i32
    %289 = tpu.dynamic_rotate %154 by %c440_i32_235 dim 1 : vector<8x512xf32>, i32 -> vector<8x512xf32>
    %c25_236 = arith.constant 25 : index
    %c0_237 = arith.constant 0 : index
    %290 = vector.load %arg5[%c25_236, %c0_237] : memref<27x512xf32, #tpu.memory_space<vmem>>, vector<1x512xf32>
    %291 = vector.broadcast %290 : vector<1x512xf32> to vector<8x512xf32>
    %292 = arith.mulf %289, %291 : vector<8x512xf32>
    %c56_238 = arith.constant 56 : index
    %c0_239 = arith.constant 0 : index
    %293 = vector.load %arg7[%c56_238, %c0_239] : memref<72x512xf32, #tpu.memory_space<vmem>>, vector<8x512xf32>
    tpu.vector_store %arg7[%c56_238, %c0_239], %292 {strides = array<i32>} : memref<72x512xf32, #tpu.memory_space<vmem>>, vector<8x512xf32>,
    %c439_i32_240 = arith.constant 439 : i32
    %294 = tpu.dynamic_rotate %154 by %c439_i32_240 dim 1 : vector<8x512xf32>, i32 -> vector<8x512xf32>
    %c26_241 = arith.constant 26 : index
    %c0_242 = arith.constant 0 : index
    %295 = vector.load %arg5[%c26_241, %c0_242] : memref<27x512xf32, #tpu.memory_space<vmem>>, vector<1x512xf32>
    %296 = vector.broadcast %295 : vector<1x512xf32> to vector<8x512xf32>
    %297 = arith.mulf %294, %296 : vector<8x512xf32>
    %c64_243 = arith.constant 64 : index
    %c0_244 = arith.constant 0 : index
    %298 = vector.load %arg7[%c64_243, %c0_244] : memref<72x512xf32, #tpu.memory_space<vmem>>, vector<8x512xf32>
    tpu.vector_store %arg7[%c64_243, %c0_244], %297 {strides = array<i32>} : memref<72x512xf32, #tpu.memory_space<vmem>>, vector<8x512xf32>,
    %c2_245 = arith.constant 2 : index
    %c0_246 = arith.constant 0 : index
    %c0_247 = arith.constant 0 : index
    %299 = vector.load %arg3[%c2_245, %c0_246, %c0_247] : memref<3x8x72xf32, #tpu.memory_space<vmem>>, vector<1x8x72xf32>
    %300 = vector.shape_cast %299 : vector<1x8x72xf32> to vector<8x72xf32>
    %c0_248 = arith.constant 0 : index
    %c0_249 = arith.constant 0 : index
    %301 = vector.load %arg7[%c0_248, %c0_249] : memref<72x512xf32, #tpu.memory_space<vmem>>, vector<72x512xf32>
    %cst_250 = arith.constant dense<0.000000e+00> : vector<8x512xf32>
    %302 = tpu.matmul %300, %301, %cst_250 {dimension_numbers = #tpu.dot_dimension_numbers<[1], [0], [0], [1], [0, 0, 1, 1], [], []>} : vector<8x72xf32>, vector<72x512xf32>, vector<8x512xf32> -> vector<8x512xf32>
    %303 = arith.addf %253, %302 : vector<8x512xf32>
    %c0_251 = arith.constant 0 : index
    %c0_252 = arith.constant 0 : index
    %304 = vector.load %arg4[%c0_251, %c0_252] : memref<8x1xf32, #tpu.memory_space<vmem>>, vector<8x1xf32>
    %305 = vector.broadcast %304 : vector<8x1xf32> to vector<8x512xf32>
    %306 = arith.addf %303, %305 : vector<8x512xf32>
    %c0_253 = arith.constant 0 : index
    %c0_254 = arith.constant 0 : index
    %307 = vector.load %arg0[%c0_253, %c0_254] : memref<8x512xf32, #tpu.memory_space<vmem>>, vector<8x512xf32>
    %308 = arith.addf %306, %307 : vector<8x512xf32>
    %cst_255 = arith.constant 0.000000e+00 : f32
    %309 = vector.broadcast %cst_255 : f32 to vector<8x512xf32>
    %310 = arith.maximumf %308, %309 : vector<8x512xf32>
    %c0_256 = arith.constant 0 : index
    %c0_257 = arith.constant 0 : index
    %311 = vector.load %arg6[%c0_256, %c0_257] : memref<8x512xf32, #tpu.memory_space<vmem>>, vector<8x512xf32>
    tpu.vector_store %arg6[%c0_256, %c0_257], %310 {strides = array<i32>} : memref<8x512xf32, #tpu.memory_space<vmem>>, vector<8x512xf32>,
    return
  }
}

</mosaic_0001>

<bundles_post_ra>
// kernel: tpu_custom_call.1
= control target key start
LH: loop header
LB: loop body
LE: loop exit
PB: predicated region body
PF: predicated region fallthrough
CT: control target
= control target key end

     0   :  { %11 = vsyncpa [#allocation4], 0  ;;  %s5167_s0 = inlined_call_operand.hbm [shape: f32[8,512], index: 0, kind: input, shape index: {}]   ;;  %s5168_s1 = inlined_call_operand.hbm [shape: f32[3,8,72], index: 1, kind: input, shape index: {}]   ;;  %s5169_s2 = inlined_call_operand.vmem [shape: f32[8,1], index: 2, kind: input, shape index: {}]   ;;  %s5170_s3 = inlined_call_operand.vmem [shape: f32[3,8,72], index: 3, kind: input, shape index: {}]   ;;  %s5171_s4 = inlined_call_operand.vmem [shape: f32[8,1], index: 4, kind: input, shape index: {}]   ;;  %s5172_s5 = inlined_call_operand.hbm [shape: f32[27,512], index: 5, kind: input, shape index: {}]   ;;  %s5173_s6 = inlined_call_operand.hbm [shape: f32[8,512], index: 6, kind: output, shape index: {}]  }
   0x1   :  { %12 = vsyncpa [#allocation7], 0 }
   0x2   :  { %13 = vsyncpa [#allocation5], 0  ;;  %s3644_s21 = smov [#allocation6]   ;;  %s3550_s25 = scalar_lea.hbm %s5168_s1, 384 }
   0x3   :  { %s29_s22 = sshll.u32 %s3644_s21, 4  ;;  %p3551_p0 = scmp.ne.s32.totalorder %s5168_s1, %s3550_s25  ;;  %s30_s22 = int_to_ptr.vmem [resolvable:$true] %s29_s22 }
   0x4   :  { %p3554_p1 = scmp.lt.u32.totalorder %s3550_s25, %s5168_s1 }
   0x6   :  { %p3556_p2 = pnand %p3554_p1, %p3551_p0 }
   0x8   :  { %3559 = shalt.err (!%p3556_p2)
}
   0x9   :  { %s3560_s30 = scalar_lea.vmem %s30_s22, 384  ;;  %p3565_p4 = scmp.lt.s32.totalorder %s30_s22, %s30_s22 }
   0xa   :  { %p3561_p3 = scmp.ne.s32.totalorder %s30_s22, %s3560_s30  ;;  %p3566_p5 = scmp.lt.s32.totalorder %s3560_s30, %s3560_s30 }
   0xc   :  { %p3567_p6 = por %p3566_p5, %p3565_p4 }
   0xe   :  { %p3568_p7 = pnand %p3567_p6, %p3561_p3 }
  0x10   :  { %3571 = shalt.err (!%p3568_p7)
}
  0x11   :  { %s3645_s7 = smov 128   ;;  %s3646_s8 = smov 8  }
  0x12   :  { %35 = dma.hbm_to_vmem [thread:$0]  %s5168_s1, 384, %s30_s22, [#allocation7], %s3645_s7, %s3645_s7, %s3646_s8  }
  0x13   :  { %s3647_s11 = smov [#allocation3]   ;;  %s3648_s13 = smov [#allocation8]  }
  0x14   :  { %s20_s12 = sshll.u32 %s3647_s11, 4  ;;  %s47_s14 = sshll.u32 %s3648_s13, 4  ;;  %s21_s12 = int_to_ptr.vmem [resolvable:$true] %s20_s12  ;;  %s48_s14 = int_to_ptr.vmem [resolvable:$true] %s47_s14 }
  0x15   :  { %s3572_s17 = scalar_lea.hbm %s5167_s0, 512 }
  0x16   :  { %p3573_p8 = scmp.ne.s32.totalorder %s5167_s0, %s3572_s17  ;;  %p3576_p9 = scmp.lt.u32.totalorder %s3572_s17, %s5167_s0 }
  0x18   :  { %p3578_p10 = pnand %p3576_p9, %p3573_p8 }
  0x1a   :  { %3581 = shalt.err (!%p3578_p10)
}
  0x1b   :  { %s3582_s1 = scalar_lea.vmem %s21_s12, 512  ;;  %p3587_p12 = scmp.lt.s32.totalorder %s21_s12, %s21_s12 }
  0x1c   :  { %p3583_p11 = scmp.ne.s32.totalorder %s21_s12, %s3582_s1  ;;  %p3588_p13 = scmp.lt.s32.totalorder %s3582_s1, %s3582_s1 }
  0x1e   :  { %p3589_p0 = por %p3588_p13, %p3587_p12 }
  0x20   :  { %p3590_p1 = pnand %p3589_p0, %p3583_p11 }
  0x22   :  { %3593 = shalt.err (!%p3590_p1)
}
  0x23   :  { %23 = dma.hbm_to_vmem [thread:$0]  %s5167_s0, 512, %s21_s12, [#allocation4]  }
  0x24   :  { %s3594_s26 = scalar_lea.hbm %s5172_s5, 2048 }
  0x25   :  { %p3595_p2 = scmp.ne.s32.totalorder %s5172_s5, %s3594_s26  ;;  %p3598_p3 = scmp.lt.u32.totalorder %s3594_s26, %s5172_s5 }
  0x27   :  { %p3600_p4 = pnand %p3598_p3, %p3595_p2 }
  0x29   :  { %3603 = shalt.err (!%p3600_p4)
}
  0x2a   :  { %s3604_s7 = scalar_lea.vmem %s48_s14, 2048  ;;  %p3609_p6 = scmp.lt.s32.totalorder %s48_s14, %s48_s14 }
  0x2b   :  { %p3605_p5 = scmp.ne.s32.totalorder %s48_s14, %s3604_s7  ;;  %p3610_p7 = scmp.lt.s32.totalorder %s3604_s7, %s3604_s7 }
  0x2d   :  { %p3611_p8 = por %p3610_p7, %p3609_p6 }
  0x2f   :  { %p3612_p9 = pnand %p3611_p8, %p3605_p5 }
  0x31   :  { %3615 = shalt.err (!%p3612_p9)
}
  0x32   :  { %s3649_s0 = smov 512   ;;  %s3650_s9 = smov 32  }
  0x33   :  { %53 = dma.hbm_to_vmem [thread:$0]  %s5172_s5, 2048, %s48_s14, [#allocation7], %s3649_s0, %s3649_s0, %s3650_s9  }
  0x34   :  { %3638 = dma.done.wait [#allocation4], 512  }
  0x35   :  { %3639 = vsyncadd [#allocation4], 4294966784 }
  0x36   :  { %3640 = dma.done.wait [#allocation7], 2432  }
  0x37   :  { %3641 = vsyncadd [#allocation7], 4294964864  ;;  %v3742_v0 = vld [vmem:[#allocation3 + $0x10] sm:$0xff]  ;;  %v3744_v1 = vld [vmem:[#allocation3] sm:$0xff]  ;;  %s3651_s12 = smov 9   ;;  %s3652_s5 = smov 7   ;;  %v75_v5 = vlaneseq }
  0x38   :  { %505 = vrot.lane.b32.xlu1 %v3742_v0, %s3651_s12  ;;  %501 = vrot.lane.b32.xlu0 %v3744_v1, %s3651_s12  ;;  %v3750_v2 = vld [vmem:[#allocation3 + $0x18] sm:$0xff]  ;;  %v3752_v3 = vld [vmem:[#allocation3 + $0x8] sm:$0xff]  ;;  %s3653_s13 = smov 1   ;;  %s3654_s14 = smov 127   ;;  %v5175_v4 = vmov 0.0   ;;  %vm922_vm10 = vcmask 588800  }
  0x39   :  { %s3655_s15 = smov 121   ;;  %s3656_s16 = smov 120   ;;  %990 = vmatprep.mubr.f32.mxu0 %v5175_v4  ;;  %1061 = vmatprep.mubr.f32.mxu1 %v5175_v4  ;;  %v85_v6 = vshrl.u32 %v75_v5, 7  ;;  %v3868_v9 = vand.u32 127, %v75_v5 }
  0x3a   :  { %s3657_s17 = smov 73   ;;  %s3658_s18 = smov 72   ;;  %v515_v12 = vld [vmem:[#allocation8 + $0x21] ss:$8 sm:$0xf] }
  0x3b   :  { %s3660_s19 = smov 119   ;;  %s3661_s20 = smov 71   ;;  %v3874_v10 = vsub.s32 0, %v85_v6  ;;  %v3876_v11 = vsub.s32 1, %v85_v6  ;;  %vm509_vm0 = vcmp.lt.s32.totalorder %v3868_v9, 9  ;;  %v3879_v16 = vsub.s32 2, %v85_v6 }
  0x3c   :  { %507 = vrot.lane.b32.xlu1 %v3750_v2, %s3651_s12  ;;  %503 = vrot.lane.b32.xlu0 %v3752_v3, %s3651_s12  ;;  %s3662_s21 = smov 65   ;;  %s3663_s1 = smov 64   ;;  %v559_v13 = vld [vmem:[#allocation8 + $0x22] ss:$8 sm:$0xf]  ;;  %v3881_v17 = vsub.s32 3, %v85_v6 }
  0x3d   :  { %s3664_s22 = smov 63   ;;  %s3665_s23 = smov 57   ;;  %vm553_vm1 = vcmp.lt.s32.totalorder %v3868_v9, 8  ;;  %v524_v18 = vrot.slane %v515_v12, %v3876_v11  ;;  %v568_v19 = vrot.slane %v559_v13, %v3876_v11  ;;  %v520_v21 = vrot.slane %v515_v12, %v3874_v10  ;;  %v603_v52 = vld [vmem:[#allocation8 + $0x23] ss:$8 sm:$0xf] }
  0x3e   :  { %s3666_s24 = smov 56   ;;  %v564_v24 = vrot.slane %v559_v13, %v3874_v10  ;;  %v532_v25 = vrot.slane %v515_v12, %v3881_v17  ;;  %v576_v26 = vrot.slane %v559_v13, %v3881_v17  ;;  %v528_v27 = vrot.slane %v515_v12, %v3879_v16  ;;  %s3667_s25 = smov 55   ;;  %v647_v53 = vld [vmem:[#allocation8 + $0x24] ss:$8 sm:$0xf] }
  0x3f   :  { %v572_v31 = vrot.slane %v559_v13, %v3879_v16  ;;  %vm597_vm2 = vcmp.lt.s32.totalorder %v3868_v9, 7  ;;  %v612_v56 = vrot.slane %v603_v52, %v3876_v11  ;;  %vm641_vm3 = vcmp.lt.s32.totalorder %v3868_v9, 1 }
  0x40   :  { %547 = vrot.lane.b32.xlu1 %v3752_v3, %s3646_s8  ;;  %545 = vrot.lane.b32.xlu0 %v3744_v1, %s3646_s8  ;;  %v656_v57 = vrot.slane %v647_v53, %v3876_v11  ;;  %v608_v59 = vrot.slane %v603_v52, %v3874_v10  ;;  %v616_v60 = vrot.slane %v603_v52, %v3879_v16  ;;  %vm716_vm4 = vcmp.lt.s32.totalorder %v3868_v9, 127 }
  0x41   :  { %v620_v61 = vrot.slane %v603_v52, %v3881_v17  ;;  %v652_v5 = vrot.slane %v647_v53, %v3874_v10  ;;  %vm804_vm5 = vcmp.lt.s32.totalorder %v3868_v9, 120  ;;  %vm760_vm6 = vcmp.lt.s32.totalorder %v3868_v9, 121 }
  0x42   :  { %vm77_vm7 = vcmp.lt.s32.totalorder %v3868_v9, 73  ;;  %vm120_vm8 = vcmp.lt.s32.totalorder %v3868_v9, 72  ;;  %vm848_vm9 = vcmp.lt.s32.totalorder %v3868_v9, 119  ;;  %vm164_vm11 = vcmp.lt.s32.totalorder %v3868_v9, 71 }
  0x43   :  { %vm208_vm12 = vcmp.lt.s32.totalorder %v3868_v9, 65  ;;  %vm5177_vm13 = vcmp.lt.s32.totalorder %v3868_v9, 64  ;;  %vm5174_vm14 = vcmp.lt.s32.totalorder %v3868_v9, 63  ;;  %vm340_vm15 = vcmp.lt.s32.totalorder %v3868_v9, 57 }
  0x44   :  { %551 = vrot.lane.b32.xlu1 %v3750_v2, %s3646_s8  ;;  %549 = vrot.lane.b32.xlu0 %v3742_v0, %s3646_s8 }
  0x48   :  { %591 = vrot.lane.b32.xlu1 %v3752_v3, %s3652_s5  ;;  %589 = vrot.lane.b32.xlu0 %v3744_v1, %s3652_s5 }
  0x4c   :  { %595 = vrot.lane.b32.xlu1 %v3750_v2, %s3652_s5  ;;  %593 = vrot.lane.b32.xlu0 %v3742_v0, %s3652_s5 }
  0x50   :  { %635 = vrot.lane.b32.xlu1 %v3752_v3, %s3653_s13  ;;  %633 = vrot.lane.b32.xlu0 %v3744_v1, %s3653_s13 }
  0x54   :  { %639 = vrot.lane.b32.xlu1 %v3750_v2, %s3653_s13  ;;  %637 = vrot.lane.b32.xlu0 %v3742_v0, %s3653_s13 }
  0x58   :  { %710 = vrot.lane.b32.xlu1 %v3752_v3, %s3654_s14  ;;  %708 = vrot.lane.b32.xlu0 %v3744_v1, %s3654_s14 }
  0x5c   :  { %714 = vrot.lane.b32.xlu1 %v3750_v2, %s3654_s14  ;;  %712 = vrot.lane.b32.xlu0 %v3742_v0, %s3654_s14 }
  0x60   :  { %754 = vrot.lane.b32.xlu1 %v3752_v3, %s3655_s15  ;;  %752 = vrot.lane.b32.xlu0 %v3744_v1, %s3655_s15 }
  0x64   :  { %758 = vrot.lane.b32.xlu1 %v3750_v2, %s3655_s15  ;;  %756 = vrot.lane.b32.xlu0 %v3742_v0, %s3655_s15 }
  0x68   :  { %798 = vrot.lane.b32.xlu1 %v3752_v3, %s3656_s16  ;;  %796 = vrot.lane.b32.xlu0 %v3744_v1, %s3656_s16 }
  0x6c   :  { %802 = vrot.lane.b32.xlu1 %v3750_v2, %s3656_s16  ;;  %800 = vrot.lane.b32.xlu0 %v3742_v0, %s3656_s16 }
  0x70   :  { %69 = vrot.lane.b32.xlu1 %v3752_v3, %s3657_s17  ;;  %67 = vrot.lane.b32.xlu0 %v3744_v1, %s3657_s17 }
  0x74   :  { %73 = vrot.lane.b32.xlu1 %v3750_v2, %s3657_s17  ;;  %71 = vrot.lane.b32.xlu0 %v3742_v0, %s3657_s17 }
  0x78   :  { %114 = vrot.lane.b32.xlu1 %v3752_v3, %s3658_s18  ;;  %112 = vrot.lane.b32.xlu0 %v3744_v1, %s3658_s18 }
  0x7c   :  { %118 = vrot.lane.b32.xlu1 %v3750_v2, %s3658_s18  ;;  %116 = vrot.lane.b32.xlu0 %v3742_v0, %s3658_s18 }
  0x80   :  { %842 = vrot.lane.b32.xlu1 %v3752_v3, %s3660_s19  ;;  %840 = vrot.lane.b32.xlu0 %v3744_v1, %s3660_s19 }
  0x84   :  { %846 = vrot.lane.b32.xlu1 %v3750_v2, %s3660_s19  ;;  %844 = vrot.lane.b32.xlu0 %v3742_v0, %s3660_s19 }
  0x88   :  { %158 = vrot.lane.b32.xlu1 %v3752_v3, %s3661_s20  ;;  %156 = vrot.lane.b32.xlu0 %v3744_v1, %s3661_s20 }
  0x8c   :  { %162 = vrot.lane.b32.xlu1 %v3750_v2, %s3661_s20  ;;  %160 = vrot.lane.b32.xlu0 %v3742_v0, %s3661_s20 }
  0x90   :  { %202 = vrot.lane.b32.xlu1 %v3752_v3, %s3662_s21  ;;  %200 = vrot.lane.b32.xlu0 %v3744_v1, %s3662_s21 }
  0x94   :  { %206 = vrot.lane.b32.xlu1 %v3750_v2, %s3662_s21  ;;  %204 = vrot.lane.b32.xlu0 %v3742_v0, %s3662_s21 }
  0x98   :  { %246 = vrot.lane.b32.xlu1 %v3752_v3, %s3663_s1  ;;  %244 = vrot.lane.b32.xlu0 %v3744_v1, %s3663_s1 }
  0x9c   :  { %250 = vrot.lane.b32.xlu1 %v3750_v2, %s3663_s1  ;;  %248 = vrot.lane.b32.xlu0 %v3742_v0, %s3663_s1 }
  0xa0   :  { %290 = vrot.lane.b32.xlu1 %v3752_v3, %s3664_s22  ;;  %288 = vrot.lane.b32.xlu0 %v3744_v1, %s3664_s22 }
  0xa4   :  { %294 = vrot.lane.b32.xlu1 %v3750_v2, %s3664_s22  ;;  %292 = vrot.lane.b32.xlu0 %v3742_v0, %s3664_s22 }
  0xa8   :  { %334 = vrot.lane.b32.xlu1 %v3752_v3, %s3665_s23  ;;  %332 = vrot.lane.b32.xlu0 %v3744_v1, %s3665_s23 }
  0xaa   :  { %v506_v7 = vpop.permute.xlu1 %505  ;;  %v502_v8 = vpop.permute.xlu0 %501 }
  0xac   :  { %338 = vrot.lane.b32.xlu1 %v3750_v2, %s3665_s23  ;;  %336 = vrot.lane.b32.xlu0 %v3742_v0, %s3665_s23 }
  0xae   :  { %v508_v14 = vpop.permute.xlu1 %507  ;;  %v504_v15 = vpop.permute.xlu0 %503 }
  0xaf   :  { %v512_v20 = vsel %vm509_vm0, %v502_v8, %v504_v15  ;;  %v513_v28 = vsel %vm509_vm0, %v508_v14, %v502_v8  ;;  %v510_v30 = vsel %vm509_vm0, %v506_v7, %v508_v14  ;;  %v511_v32 = vsel %vm509_vm0, %v504_v15, %v506_v7 }
  0xb0   :  { %378 = vrot.lane.b32.xlu1 %v3752_v3, %s3666_s24  ;;  %376 = vrot.lane.b32.xlu0 %v3744_v1, %s3666_s24  ;;  %v538_v33 = vmul.f32 %v524_v18, %v512_v20  ;;  %v537_v38 = vmul.f32 %v520_v21, %v513_v28  ;;  %v540_v39 = vmul.f32 %v532_v25, %v510_v30  ;;  %v678_v25 = vld [vmem:[#allocation8 + $0x25] ss:$8 sm:$0xf] }
  0xb1   :  { %v539_v43 = vmul.f32 %v528_v27, %v511_v32  ;;  %v660_v15 = vrot.slane %v647_v53, %v3879_v16  ;;  %v664_v18 = vrot.slane %v647_v53, %v3881_v17 }
  0xb2   :  { %v548_v22 = vpop.permute.xlu1 %547  ;;  %v546_v23 = vpop.permute.xlu0 %545 }
  0xb3   :  { %v556_v29 = vsel %vm553_vm1, %v546_v23, %v548_v22 }
  0xb4   :  { %382 = vrot.lane.b32.xlu1 %v3750_v2, %s3666_s24  ;;  %380 = vrot.lane.b32.xlu0 %v3742_v0, %s3666_s24  ;;  %v582_v34 = vmul.f32 %v568_v19, %v556_v29  ;;  %v1679_v29 = vld [vmem:[%s5169_s2] sm:$0xff] }
  0xb6   :  { %v552_v35 = vpop.permute.xlu1 %551  ;;  %v550_v36 = vpop.permute.xlu0 %549  ;;  %v3315_v37 = vpack.c.bf16 %v582_v34, %v538_v33  ;;  %v722_v33 = vld [vmem:[#allocation8 + $0x26] ss:$8 sm:$0xf]  ;;  %v3668_v34 = vmov 0  }
  0xb7   :  { %v557_v40 = vsel %vm553_vm1, %v552_v35, %v546_v23  ;;  %v555_v41 = vsel %vm553_vm1, %v548_v22, %v550_v36  ;;  %v554_v42 = vsel %vm553_vm1, %v550_v36, %v552_v35  ;;  %3549 = vset.pattern.permute.xlu0 %v3668_v34  ;;  %v687_v35 = vrot.slane %v678_v25, %v3876_v11 }
  0xb8   :  { %422 = vrot.lane.b32.xlu1 %v3752_v3, %s3667_s25  ;;  %420 = vrot.lane.b32.xlu0 %v3744_v1, %s3667_s25  ;;  %v581_v44 = vmul.f32 %v564_v24, %v557_v40  ;;  %v584_v45 = vmul.f32 %v576_v26, %v554_v42  ;;  %v583_v46 = vmul.f32 %v572_v31, %v555_v41 }
  0xb9   :  { %3316 = vmatprep.subr.bf16.mxu0 %v3315_v37  ;;  %v695_v36 = vrot.slane %v678_v25, %v3881_v17  ;;  %v683_v37 = vrot.slane %v678_v25, %v3874_v10 }
  0xba   :  { %v592_v47 = vpop.permute.xlu1 %591  ;;  %v590_v48 = vpop.permute.xlu0 %589  ;;  %v3317_v49 = vpack.c.bf16 %v581_v44, %v537_v38  ;;  %v3331_v50 = vpack.c.bf16 %v584_v45, %v540_v39  ;;  %v3333_v51 = vpack.c.bf16 %v583_v46, %v539_v43  ;;  %v691_v43 = vrot.slane %v678_v25, %v3879_v16 }
  0xbb   :  { %v600_v58 = vsel %vm597_vm2, %v590_v48, %v592_v47  ;;  %v727_v44 = vrot.slane %v722_v33, %v3874_v10  ;;  %v739_v45 = vrot.slane %v722_v33, %v3881_v17  ;;  %v703_v52 = vmul.f32 %v695_v36, %v3750_v2 }
  0xbc   :  { %426 = vrot.lane.b32.xlu1 %v3750_v2, %s3667_s25  ;;  %424 = vrot.lane.b32.xlu0 %v3742_v0, %s3667_s25  ;;  %v626_v13 = vmul.f32 %v612_v56, %v600_v58  ;;  %v700_v53 = vmul.f32 %v683_v37, %v3744_v1 }
  0xbd   :  { %3318 = vmatpush1.bf16.msra.mxu0 %v3317_v49  ;;  %3332 = vmatprep.subr.bf16.mxu1 %v3331_v50 }
  0xbe   :  { %3334 = vmatpush1.bf16.msra.mxu1 %v3333_v51  ;;  %v596_v54 = vpop.permute.xlu1 %595  ;;  %v594_v55 = vpop.permute.xlu0 %593  ;;  %v701_v51 = vmul.f32 %v687_v35, %v3752_v3 }
  0xbf   :  { %v601_v6 = vsel %vm597_vm2, %v596_v54, %v590_v48  ;;  %v598_v7 = vsel %vm597_vm2, %v594_v55, %v596_v54  ;;  %v599_v8 = vsel %vm597_vm2, %v592_v47, %v594_v55  ;;  %v731_v47 = vrot.slane %v722_v33, %v3876_v11 }
  0xc0   :  { %v625_v19 = vmul.f32 %v608_v59, %v601_v6  ;;  %v627_v20 = vmul.f32 %v616_v60, %v599_v8  ;;  %v628_v21 = vmul.f32 %v620_v61, %v598_v7  ;;  %1682 = vperm.xlu0 %3549, %v1679_v29   ;;  %v735_v48 = vrot.slane %v722_v33, %v3879_v16  ;;  %v810_v7 = vld [vmem:[#allocation8 + $0x40] ss:$8 sm:$0xf]  ;;  %v766_v8 = vld [vmem:[#allocation8 + $0x27] ss:$8 sm:$0xf] }
  0xc1   :  { %v702_v54 = vmul.f32 %v691_v43, %v3742_v0  ;;  %v823_v25 = vrot.slane %v810_v7, %v3879_v16 }
  0xc2   :  { %v636_v62 = vpop.permute.xlu1 %635  ;;  %v634_v63 = vpop.permute.xlu0 %633 }
  0xc3   :  { %v644_v12 = vsel %vm641_vm3, %v634_v63, %v636_v62 }
  0xc4   :  { %v670_v14 = vmul.f32 %v656_v57, %v644_v12  ;;  %v783_v12 = vrot.slane %v766_v8, %v3881_v17 }
  0xc6   :  { %v640_v22 = vpop.permute.xlu1 %639  ;;  %v638_v23 = vpop.permute.xlu0 %637  ;;  %v3319_v24 = vpack.c.bf16 %v670_v14, %v626_v13  ;;  %v775_v13 = vrot.slane %v766_v8, %v3876_v11 }
  0xc7   :  { %v645_v26 = vsel %vm641_vm3, %v640_v22, %v634_v63  ;;  %v642_v27 = vsel %vm641_vm3, %v638_v23, %v640_v22  ;;  %v643_v28 = vsel %vm641_vm3, %v636_v62, %v638_v23  ;;  %v827_v23 = vrot.slane %v810_v7, %v3881_v17 }
  0xc8   :  { %v669_v30 = vmul.f32 %v652_v5, %v645_v26  ;;  %v671_v31 = vmul.f32 %v660_v15, %v643_v28  ;;  %v672_v32 = vmul.f32 %v664_v18, %v642_v27  ;;  %3320 = vmatprep.subr.bf16.mxu0 %v3319_v24  ;;  %v819_v24 = vrot.slane %v810_v7, %v3876_v11 }
  0xc9   :  { %v771_v26 = vrot.slane %v766_v8, %v3874_v10 }
  0xca   :  { %v711_v38 = vpop.permute.xlu1 %710  ;;  %v709_v39 = vpop.permute.xlu0 %708  ;;  %v3321_v40 = vpack.c.bf16 %v669_v30, %v625_v19  ;;  %v3335_v41 = vpack.c.bf16 %v672_v32, %v628_v21  ;;  %v3337_v42 = vpack.c.bf16 %v671_v31, %v627_v20  ;;  %v779_v19 = vrot.slane %v766_v8, %v3879_v16 }
  0xcb   :  { %v719_v46 = vsel %vm716_vm4, %v709_v39, %v711_v38  ;;  %v815_v21 = vrot.slane %v810_v7, %v3874_v10 }
  0xcc   :  { %3322 = vmatpush1.bf16.msra.mxu0 %v3321_v40  ;;  %3336 = vmatprep.subr.bf16.mxu1 %v3335_v41  ;;  %v744_v55 = vmul.f32 %v727_v44, %v719_v46 }
  0xcd   :  { %3338 = vmatpush1.bf16.msra.mxu1 %v3337_v42 }
  0xce   :  { %v715_v49 = vpop.permute.xlu1 %714  ;;  %v713_v50 = vpop.permute.xlu0 %712  ;;  %v3325_v5 = vpack.c.bf16 %v744_v55, %v700_v53  ;;  %v126_v53 = vld [vmem:[#allocation8 + $0x1] ss:$8 sm:$0xf] }
  0xcf   :  { %v720_v56 = vsel %vm716_vm4, %v715_v49, %v709_v39  ;;  %v717_v57 = vsel %vm716_vm4, %v713_v50, %v715_v49  ;;  %v718_v58 = vsel %vm716_vm4, %v711_v38, %v713_v50 }
  0xd0   :  { %v747_v59 = vmul.f32 %v739_v45, %v720_v56  ;;  %v745_v60 = vmul.f32 %v731_v47, %v718_v58  ;;  %v746_v61 = vmul.f32 %v735_v48, %v717_v57  ;;  %v854_v58 = vld [vmem:[#allocation8 + $0x41] ss:$8 sm:$0xf] }
  0xd1   :  { %v859_v8 = vrot.slane %v854_v58, %v3874_v10 }
  0xd2   :  { %v755_v3 = vpop.permute.xlu1 %754  ;;  %v753_v62 = vpop.permute.xlu0 %752  ;;  %v3323_v2 = vpack.c.bf16 %v745_v60, %v701_v51  ;;  %v3339_v63 = vpack.c.bf16 %v747_v59, %v703_v52  ;;  %v3341_v1 = vpack.c.bf16 %v746_v61, %v702_v54  ;;  %v82_v52 = vld [vmem:[#allocation8] ss:$8 sm:$0xf]  ;;  %v135_v61 = vrot.slane %v126_v53, %v3876_v11 }
  0xd3   :  { %v763_v28 = vsel %vm760_vm6, %v753_v62, %v755_v3  ;;  %v91_v56 = vrot.slane %v82_v52, %v3876_v11  ;;  %v87_v57 = vrot.slane %v82_v52, %v3874_v10  ;;  %v95_v59 = vrot.slane %v82_v52, %v3879_v16 }
  0xd4   :  { %3324 = vmatprep.subr.bf16.mxu0 %v3323_v2  ;;  %3340 = vmatprep.subr.bf16.mxu1 %v3339_v63  ;;  %v788_v41 = vmul.f32 %v771_v26, %v763_v28  ;;  %v99_v60 = vrot.slane %v82_v52, %v3881_v17  ;;  %v139_v2 = vrot.slane %v126_v53, %v3879_v16 }
  0xd5   :  { %3326 = vmatpush1.bf16.msra.mxu0 %v3325_v5  ;;  %3342 = vmatpush1.bf16.msra.mxu1 %v3341_v1  ;;  %v143_v63 = vrot.slane %v126_v53, %v3881_v17 }
  0xd6   :  { %v759_v0 = vpop.permute.xlu1 %758  ;;  %v757_v6 = vpop.permute.xlu0 %756 }
  0xd7   :  { %v764_v18 = vsel %vm760_vm6, %v759_v0, %v753_v62  ;;  %v762_v20 = vsel %vm760_vm6, %v755_v3, %v757_v6  ;;  %v761_v27 = vsel %vm760_vm6, %v757_v6, %v759_v0  ;;  %v131_v3 = vrot.slane %v126_v53, %v3874_v10 }
  0xd8   :  { %v791_v29 = vmul.f32 %v783_v12, %v764_v18  ;;  %v789_v30 = vmul.f32 %v775_v13, %v762_v20  ;;  %v790_v37 = vmul.f32 %v779_v19, %v761_v27  ;;  %v871_v13 = vrot.slane %v854_v58, %v3881_v17 }
  0xda   :  { %v799_v14 = vpop.permute.xlu1 %798  ;;  %v797_v15 = vpop.permute.xlu0 %796 }
  0xdb   :  { %v807_v22 = vsel %vm804_vm5, %v797_v15, %v799_v14 }
  0xdc   :  { %v832_v33 = vmul.f32 %v815_v21, %v807_v22 }
  0xde   :  { %v803_v31 = vpop.permute.xlu1 %802  ;;  %v801_v32 = vpop.permute.xlu0 %800  ;;  %v3329_v47 = vpack.c.bf16 %v832_v33, %v788_v41 }
  0xdf   :  { %v808_v34 = vsel %vm804_vm5, %v803_v31, %v797_v15  ;;  %v805_v35 = vsel %vm804_vm5, %v801_v32, %v803_v31  ;;  %v806_v36 = vsel %vm804_vm5, %v799_v14, %v801_v32  ;;  %v863_v14 = vrot.slane %v854_v58, %v3876_v11 }
  0xe0   :  { %v835_v38 = vmul.f32 %v827_v23, %v808_v34  ;;  %v833_v39 = vmul.f32 %v819_v24, %v806_v36  ;;  %v834_v40 = vmul.f32 %v823_v25, %v805_v35  ;;  %v867_v15 = vrot.slane %v854_v58, %v3879_v16 }
  0xe2   :  { %v70_v42 = vpop.permute.xlu1 %69  ;;  %v68_v43 = vpop.permute.xlu0 %67  ;;  %v3327_v44 = vpack.c.bf16 %v833_v39, %v789_v30  ;;  %v3343_v45 = vpack.c.bf16 %v835_v38, %v791_v29  ;;  %v3345_v46 = vpack.c.bf16 %v834_v40, %v790_v37 }
  0xe3   :  { %v4010_v62 = vsel %vm77_vm7, %v68_v43, %v70_v42 }
  0xe4   :  { %3328 = vmatprep.subr.bf16.mxu0 %v3327_v44  ;;  %3344 = vmatprep.subr.bf16.mxu1 %v3343_v45  ;;  %v105_v18 = vmul.f32 %v91_v56, %v4010_v62 }
  0xe5   :  { %3330 = vmatpush1.bf16.msra.mxu0 %v3329_v47  ;;  %3346 = vmatpush1.bf16.msra.mxu1 %v3345_v46  ;;  %v170_v46 = vld [vmem:[#allocation8 + $0x2] ss:$8 sm:$0xf]  ;;  %v214_v47 = vld [vmem:[#allocation8 + $0x3] ss:$8 sm:$0xf] }
  0xe6   :  { %v74_v48 = vpop.permute.xlu1 %73  ;;  %v72_v49 = vpop.permute.xlu0 %71  ;;  %v175_v53 = vrot.slane %v170_v46, %v3874_v10 }
  0xe7   :  { %v4017_v0 = vsel %vm77_vm7, %v72_v49, %v74_v48  ;;  %v4038_v19 = vsel %vm77_vm7, %v74_v48, %v68_v43  ;;  %v4042_v20 = vsel %vm77_vm7, %v70_v42, %v72_v49  ;;  %v885_v43 = vld [vmem:[#allocation6 + $0x8] sm:$0xff] }
  0xe8   :  { %v107_v22 = vmul.f32 %v99_v60, %v4017_v0  ;;  %v104_v36 = vmul.f32 %v87_v57, %v4038_v19  ;;  %v106_v38 = vmul.f32 %v95_v59, %v4042_v20  ;;  %v219_v60 = vrot.slane %v214_v47, %v3874_v10 }
  0xea   :  { %v115_v50 = vpop.permute.xlu1 %114  ;;  %v113_v51 = vpop.permute.xlu0 %112 }
  0xeb   :  { %v4021_v6 = vsel %vm120_vm8, %v113_v51, %v115_v50 }
  0xec   :  { %v149_v23 = vmul.f32 %v135_v61, %v4021_v6  ;;  %v227_v61 = vrot.slane %v214_v47, %v3879_v16 }
  0xee   :  { %v119_v54 = vpop.permute.xlu1 %118  ;;  %v117_v55 = vpop.permute.xlu0 %116  ;;  %v3347_v41 = vpack.c.bf16 %v149_v23, %v105_v18 }
  0xef   :  { %v4025_v7 = vsel %vm120_vm8, %v117_v55, %v119_v54  ;;  %v4030_v12 = vsel %vm120_vm8, %v119_v54, %v113_v51  ;;  %v4046_v21 = vsel %vm120_vm8, %v115_v50, %v117_v55  ;;  %v179_v50 = vrot.slane %v170_v46, %v3876_v11 }
  0xf0   :  { %v151_v24 = vmul.f32 %v143_v63, %v4025_v7  ;;  %v148_v28 = vmul.f32 %v131_v3, %v4030_v12  ;;  %v150_v32 = vmul.f32 %v139_v2, %v4046_v21  ;;  %v223_v51 = vrot.slane %v214_v47, %v3876_v11 }
  0xf1   :  { %v183_v54 = vrot.slane %v170_v46, %v3879_v16  ;;  %v187_v55 = vrot.slane %v170_v46, %v3881_v17 }
  0xf2   :  { %v843_v1 = vpop.permute.xlu1 %842  ;;  %v841_v5 = vpop.permute.xlu0 %840  ;;  %v3363_v42 = vpack.c.bf16 %v151_v24, %v107_v22  ;;  %v3349_v44 = vpack.c.bf16 %v148_v28, %v104_v36  ;;  %v3365_v45 = vpack.c.bf16 %v150_v32, %v106_v38 }
  0xf3   :  { %v851_v25 = vsel %vm848_vm9, %v841_v5, %v843_v1 }
  0xf4   :  { %v876_v37 = vmul.f32 %v859_v8, %v851_v25 }
  0xf6   :  { %v847_v26 = vpop.permute.xlu1 %846  ;;  %v845_v27 = vpop.permute.xlu0 %844 }
  0xf7   :  { %v852_v29 = vsel %vm848_vm9, %v847_v26, %v841_v5  ;;  %v849_v30 = vsel %vm848_vm9, %v845_v27, %v847_v26  ;;  %v850_v31 = vsel %vm848_vm9, %v843_v1, %v845_v27  ;;  %v231_v1 = vrot.slane %v214_v47, %v3881_v17 }
  0xf8   :  { %v879_v33 = vmul.f32 %v871_v13, %v852_v29  ;;  %v877_v34 = vmul.f32 %v863_v14, %v850_v31  ;;  %v878_v35 = vmul.f32 %v867_v15, %v849_v30 }
  0xfa   :  { %v159_v39 = vpop.permute.xlu1 %158  ;;  %1013 = vmatprep.subr.mxu1 %v879_v33  ;;  %v157_v40 = vpop.permute.xlu0 %156  ;;  %942 = vmatprep.subr.mxu0 %v877_v34  ;;  %v258_v34 = vld [vmem:[#allocation8 + $0x4] ss:$8 sm:$0xf] }
  0xfb   :  { %943 = vmatpush1.msra.mxu0 %v876_v37  ;;  %1014 = vmatpush1.msra.mxu1 %v878_v35  ;;  %v4073_v52 = vsel %vm164_vm11, %v157_v40, %v159_v39  ;;  %v302_v35 = vld [vmem:[#allocation8 + $0x5] ss:$8 sm:$0xf]  ;;  %v267_v38 = vrot.slane %v258_v34, %v3876_v11 }
  0xfc   :  { %3348 = vmatprep.subr.bf16.mxu0 %v3347_v41  ;;  %3364 = vmatprep.subr.bf16.mxu1 %v3363_v42  ;;  %v193_v3 = vmul.f32 %v179_v50, %v4073_v52  ;;  %v263_v41 = vrot.slane %v258_v34, %v3874_v10  ;;  %v271_v42 = vrot.slane %v258_v34, %v3879_v16 }
  0xfd   :  { %3301 = vmatmul.mubr.msk.f32.vlgmr.msra.gmra.mrb[0].mxu0 %vm922_vm10, %v885_v43  ;;  %3302 = vmatmul.mubr.msk.f32.vlgmr.msra.gmra.mrb[0].mxu1 %vm922_vm10, %v885_v43  ;;  %v275_v43 = vrot.slane %v258_v34, %v3881_v17 }
  0xfe   :  { %3350 = vmatpush1.bf16.msra.mxu0 %v3349_v44  ;;  %3366 = vmatpush1.bf16.msra.mxu1 %v3365_v45  ;;  %v163_v48 = vpop.permute.xlu1 %162  ;;  %v161_v49 = vpop.permute.xlu0 %160 }
  0xff   :  { %1135 = vmatprep.mubr.f32.mxu0 %v5175_v4  ;;  %1206 = vmatprep.mubr.f32.mxu1 %v5175_v4  ;;  %v4080_v58 = vsel %vm164_vm11, %v163_v48, %v157_v40  ;;  %v4091_v2 = vsel %vm164_vm11, %v159_v39, %v161_v49  ;;  %v4097_v5 = vsel %vm164_vm11, %v161_v49, %v163_v48 }
 0x100   :  { %v192_v8 = vmul.f32 %v175_v53, %v4080_v58  ;;  %v194_v18 = vmul.f32 %v183_v54, %v4091_v2  ;;  %v195_v25 = vmul.f32 %v187_v55, %v4097_v5  ;;  %v311_v39 = vrot.slane %v302_v35, %v3876_v11 }
 0x101   :  { %v307_v48 = vrot.slane %v302_v35, %v3874_v10  ;;  %v315_v49 = vrot.slane %v302_v35, %v3879_v16  ;;  %v319_v54 = vrot.slane %v302_v35, %v3881_v17 }
 0x102   :  { %v203_v56 = vpop.permute.xlu1 %202  ;;  %v201_v57 = vpop.permute.xlu0 %200 }
 0x103   :  { %v4084_v59 = vsel %vm208_vm12, %v201_v57, %v203_v56 }
 0x104   :  { %v237_v63 = vmul.f32 %v223_v51, %v4084_v59 }
 0x106   :  { %v207_v13 = vpop.permute.xlu1 %206  ;;  %v205_v14 = vpop.permute.xlu0 %204  ;;  %v3351_v15 = vpack.c.bf16 %v237_v63, %v193_v3 }
 0x107   :  { %v4103_v22 = vsel %vm208_vm12, %v207_v13, %v201_v57  ;;  %v4107_v23 = vsel %vm208_vm12, %v205_v14, %v207_v13  ;;  %v4111_v24 = vsel %vm208_vm12, %v203_v56, %v205_v14 }
 0x108   :  { %v236_v26 = vmul.f32 %v219_v60, %v4103_v22  ;;  %v238_v27 = vmul.f32 %v227_v61, %v4111_v24  ;;  %v239_v28 = vmul.f32 %v231_v1, %v4107_v23  ;;  %3352 = vmatprep.subr.bf16.mxu0 %v3351_v15 }
 0x10a   :  { %v3353_v29 = vpack.c.bf16 %v236_v26, %v192_v8  ;;  %v3369_v30 = vpack.c.bf16 %v238_v27, %v194_v18  ;;  %v247_v31 = vpop.permute.xlu1 %246  ;;  %v245_v32 = vpop.permute.xlu0 %244  ;;  %v3367_v33 = vpack.c.bf16 %v239_v28, %v195_v25  ;;  %v4167_v25 = vld [vmem:[#allocation8 + $0x42] ss:$8 sm:$0xf] }
 0x10b   :  { %v4123_v40 = vsel %vm5177_vm13, %v245_v32, %v247_v31 }
 0x10c   :  { %3354 = vmatpush1.bf16.msra.mxu0 %v3353_v29  ;;  %3368 = vmatprep.subr.bf16.mxu1 %v3367_v33  ;;  %v281_v50 = vmul.f32 %v267_v38, %v4123_v40  ;;  %v390_v38 = vld [vmem:[#allocation8 + $0x7] ss:$8 sm:$0xf] }
 0x10d   :  { %3370 = vmatpush1.bf16.msra.mxu1 %v3369_v30 }
 0x10e   :  { %v251_v36 = vpop.permute.xlu1 %250  ;;  %v249_v37 = vpop.permute.xlu0 %248 }
 0x10f   :  { %v4130_v46 = vsel %vm5177_vm13, %v251_v36, %v245_v32  ;;  %v4141_v51 = vsel %vm5177_vm13, %v247_v31, %v249_v37  ;;  %v4147_v55 = vsel %vm5177_vm13, %v249_v37, %v251_v36  ;;  %v4169_v31 = vld [vmem:[#allocation8 + $0x43] ss:$8 sm:$0xf]  ;;  %v4171_v32 = vld [vmem:[#allocation8 + $0x44] ss:$8 sm:$0xf] }
 0x110   :  { %v280_v56 = vmul.f32 %v263_v41, %v4130_v46  ;;  %v282_v3 = vmul.f32 %v271_v42, %v4141_v51  ;;  %v283_v13 = vmul.f32 %v275_v43, %v4147_v55  ;;  %v346_v37 = vld [vmem:[#allocation8 + $0x6] ss:$8 sm:$0xf]  ;;  %v4187_v43 = vld [vmem:[#allocation8 + $0x45] ss:$8 sm:$0xf] }
 0x111   :  { %v4249_v41 = vld [vmem:[#allocation8 + $0x47] ss:$8 sm:$0xf]  ;;  %vm428_vm13 = vcmp.lt.s32.totalorder %v3868_v9, 55 }
 0x112   :  { %v291_v44 = vpop.permute.xlu1 %290  ;;  %v289_v45 = vpop.permute.xlu0 %288  ;;  %v1386_v35 = vrot.slane %v4249_v41, %v3881_v17 }
 0x113   :  { %v4134_v47 = vsel %vm5174_vm14, %v289_v45, %v291_v44 }
 0x114   :  { %v325_v53 = vmul.f32 %v311_v39, %v4134_v47 }
 0x116   :  { %v295_v57 = vpop.permute.xlu1 %294  ;;  %v293_v60 = vpop.permute.xlu0 %292  ;;  %v3355_v61 = vpack.c.bf16 %v325_v53, %v281_v50  ;;  %v4230_v50 = vld [vmem:[#allocation8 + $0x20] ss:$8 sm:$0xf] }
 0x117   :  { %v4153_v63 = vsel %vm5174_vm14, %v295_v57, %v289_v45  ;;  %v4157_v1 = vsel %vm5174_vm14, %v293_v60, %v295_v57  ;;  %v4161_v8 = vsel %vm5174_vm14, %v291_v44, %v293_v60  ;;  %vm384_vm14 = vcmp.lt.s32.totalorder %v3868_v9, 56 }
 0x118   :  { %v324_v14 = vmul.f32 %v307_v48, %v4153_v63  ;;  %v326_v15 = vmul.f32 %v315_v49, %v4161_v8  ;;  %v327_v18 = vmul.f32 %v319_v54, %v4157_v1  ;;  %3356 = vmatprep.subr.bf16.mxu0 %v3355_v61  ;;  %v399_v57 = vrot.slane %v390_v38, %v3876_v11 }
 0x119   :  { %v403_v60 = vrot.slane %v390_v38, %v3879_v16  ;;  %v443_v36 = vrot.slane %v4230_v50, %v3876_v11 }
 0x11a   :  { %v3357_v26 = vpack.c.bf16 %v324_v14, %v280_v56  ;;  %v3373_v27 = vpack.c.bf16 %v326_v15, %v282_v3  ;;  %v335_v28 = vpop.permute.xlu1 %334  ;;  %v333_v29 = vpop.permute.xlu0 %332  ;;  %v3371_v30 = vpack.c.bf16 %v327_v18, %v283_v13  ;;  %v355_v56 = vrot.slane %v346_v37, %v3876_v11  ;;  %v4215_v15 = vld [vmem:[#allocation8 + $0x46] ss:$8 sm:$0xf] }
 0x11b   :  { %v4211_v13 = vsel %vm340_vm15, %v333_v29, %v335_v28  ;;  %v351_v18 = vrot.slane %v346_v37, %v3874_v10  ;;  %v395_v14 = vrot.slane %v390_v38, %v3874_v10 }
 0x11c   :  { %3358 = vmatpush1.bf16.msra.mxu0 %v3357_v26  ;;  %3372 = vmatprep.subr.bf16.mxu1 %v3371_v30  ;;  %v359_v26 = vrot.slane %v346_v37, %v3879_v16  ;;  %v369_v53 = vmul.f32 %v355_v56, %v4211_v13 }
 0x11d   :  { %3374 = vmatpush1.bf16.msra.mxu1 %v3373_v27  ;;  %v363_v27 = vrot.slane %v346_v37, %v3881_v17 }
 0x11e   :  { %v339_v44 = vpop.permute.xlu1 %338  ;;  %v337_v45 = vpop.permute.xlu0 %336 }
 0x11f   :  { %v4222_v54 = vsel %vm340_vm15, %v339_v44, %v333_v29  ;;  %v4235_v37 = vsel %vm340_vm15, %v335_v28, %v337_v45  ;;  %v407_v29 = vrot.slane %v390_v38, %v3881_v17  ;;  %v4247_v56 = vsel %vm340_vm15, %v337_v45, %v339_v44 }
 0x120   :  { %5182 = vst [vmem:[#allocation13_spill] sm:$0xff] %v4247_v56  ;;  %v368_v28 = vmul.f32 %v351_v18, %v4222_v54  ;;  %v370_v3 = vmul.f32 %v359_v26, %v4235_v37 }
 0x122   :  { %v379_v30 = vpop.permute.xlu1 %378  ;;  %v377_v4 = vpop.permute.xlu0 %376 }
 0x123   :  { %v4226_v49 = vsel %vm384_vm14, %v377_v4, %v379_v30 }
 0x124   :  { %v413_v61 = vmul.f32 %v399_v57, %v4226_v49 }
 0x126   :  { %v383_v57 = vpop.permute.xlu1 %382  ;;  %v381_v39 = vpop.permute.xlu0 %380  ;;  %v3359_v38 = vpack.c.bf16 %v413_v61, %v369_v53  ;;  %v371_v53 = vmul.f32 %v363_v27, %v4247_v56  ;;  %v4282_v27 = vld [vmem:[#allocation8 + $0x60] ss:$8 sm:$0xf] }
 0x127   :  { %v4258_v48 = vsel %vm384_vm14, %v383_v57, %v377_v4  ;;  %v4262_v44 = vsel %vm384_vm14, %v381_v39, %v383_v57  ;;  %v4266_v45 = vsel %vm384_vm14, %v379_v30, %v381_v39  ;;  %v1378_v39 = vrot.slane %v4249_v41, %v3876_v11 }
 0x128   :  { %v412_v61 = vmul.f32 %v395_v14, %v4258_v48  ;;  %v414_v18 = vmul.f32 %v403_v60, %v4266_v45  ;;  %v415_v26 = vmul.f32 %v407_v29, %v4262_v44  ;;  %3360 = vmatprep.subr.bf16.mxu0 %v3359_v38  ;;  %v4284_v60 = vld [vmem:[#allocation8 + $0x61] ss:$8 sm:$0xf]  ;;  %v439_v14 = vrot.slane %v4230_v50, %v3874_v10 }
 0x12a   :  { %v3361_v30 = vpack.c.bf16 %v412_v61, %v368_v28  ;;  %v3377_v29 = vpack.c.bf16 %v414_v18, %v370_v3  ;;  %v423_v38 = vpop.permute.xlu1 %422  ;;  %v421_v4 = vpop.permute.xlu0 %420  ;;  %v3375_v34 = vpack.c.bf16 %v415_v26, %v371_v53  ;;  %v447_v3 = vrot.slane %v4230_v50, %v3879_v16 }
 0x12b   :  { %v4292_v33 = vsel %vm428_vm13, %v421_v4, %v423_v38  ;;  %v451_v28 = vrot.slane %v4230_v50, %v3881_v17  ;;  %v5183_v53 = vrot.slane %v4167_v25, %v3874_v10  ;;  %v5184_v18 = vrot.slane %v4169_v31, %v3876_v11 }
 0x12c   :  { %v457_v56 = vmul.f32 %v443_v36, %v4292_v33  ;;  %3362 = vmatpush1.bf16.msra.mxu0 %v3361_v30  ;;  %3376 = vmatprep.subr.bf16.mxu1 %v3375_v34  ;;  %v1448_v34 = vrot.slane %v4284_v60, %v3881_v17  ;;  %v5185_v50 = vrot.slane %v4167_v25, %v3881_v17 }
 0x12d   :  { %v1236_v61 = vmul.f32 %v5183_v53, %v4010_v62  ;;  %v1268_v26 = vmul.f32 %v5184_v18, %v4046_v21  ;;  %3378 = vmatpush1.bf16.msra.mxu1 %v3377_v29  ;;  %v5186_v62 = vrot.slane %v4167_v25, %v3876_v11  ;;  %v5187_v21 = vrot.slane %v4169_v31, %v3874_v10 }
 0x12e   :  { %v1239_v30 = vmul.f32 %v5185_v50, %v4038_v19  ;;  %v5188_v36 = vrot.slane %v4169_v31, %v3881_v17  ;;  %v427_v57 = vpop.permute.xlu1 %426  ;;  %v425_v42 = vpop.permute.xlu0 %424  ;;  %1087 = vmatprep.subr.mxu0 %v457_v56  ;;  %v5189_v19 = vrot.slane %v4169_v31, %v3879_v16 }
 0x12f   :  { %v1237_v53 = vmul.f32 %v5186_v62, %v4042_v20  ;;  %v1267_v18 = vmul.f32 %v5187_v21, %v4021_v6  ;;  %v4335_v20 = vsel %vm428_vm13, %v427_v57, %v421_v4  ;;  %v4339_v6 = vsel %vm428_vm13, %v425_v42, %v427_v57 }
 0x130   :  { %v1270_v29 = vmul.f32 %v5188_v36, %v4030_v12  ;;  %v1269_v50 = vmul.f32 %v5189_v19, %v4025_v7  ;;  %v4343_v62 = vsel %vm428_vm13, %v423_v38, %v425_v42  ;;  %v5190_v12 = vrot.slane %v4187_v43, %v3876_v11  ;;  %v464_v19 = vld [vmem:[#allocation6] sm:$0xff] }
 0x131   :  { %v456_v31 = vmul.f32 %v439_v14, %v4335_v20  ;;  %v458_v7 = vmul.f32 %v447_v3, %v4343_v62  ;;  %v459_v4 = vmul.f32 %v451_v28, %v4339_v6  ;;  %v5191_v57 = vrot.slane %v4167_v25, %v3879_v16 }
 0x132   :  { %v1330_v56 = vmul.f32 %v5190_v12, %v4111_v24  ;;  %v5192_v42 = vrot.slane %v4187_v43, %v3881_v17  ;;  %v1440_v21 = vrot.slane %v4284_v60, %v3876_v11  ;;  %v3379_v24 = vpack.c.bf16 %v1268_v26, %v1237_v53 }
 0x133   :  { %v1238_v36 = vmul.f32 %v5191_v57, %v4017_v0  ;;  %v3381_v14 = vpack.c.bf16 %v1267_v18, %v1236_v61  ;;  %v5193_v3 = vrot.slane %v4171_v32, %v3876_v11  ;;  %1088 = vmatpush1.msra.mxu0 %v456_v31  ;;  %1158 = vmatprep.subr.mxu1 %v459_v4  ;;  %v5202_v31 = vmov 0.0  }
 0x134   :  { %v1332_v38 = vmul.f32 %v5192_v42, %v4103_v22  ;;  %v3395_v25 = vpack.c.bf16 %v1270_v29, %v1239_v30  ;;  %v5194_v12 = vrot.slane %v4171_v32, %v3881_v17  ;;  %v5195_v26 = vrot.slane %v4187_v43, %v3874_v10  ;;  %1159 = vmatpush1.msra.mxu1 %v458_v7 }
 0x135   :  { %v1299_v28 = vmul.f32 %v5193_v3, %v4091_v2  ;;  %v3397_v0 = vpack.c.bf16 %v1269_v50, %v1238_v36  ;;  %3380 = vmatprep.subr.bf16.mxu0 %v3379_v24  ;;  %v5196_v2 = vrot.slane %v4187_v43, %v3879_v16  ;;  %v1392_v30 = vmul.f32 %v1378_v39, %v4161_v8 }
 0x136   :  { %v1301_v22 = vmul.f32 %v5194_v12, %v4080_v58  ;;  %v1329_v53 = vmul.f32 %v5195_v26, %v4084_v59  ;;  %3303 = vmatmul.mubr.msk.f32.vlgmr.msra.gmra.mrb[0].mxu0 %vm922_vm10, %v464_v19  ;;  %3396 = vmatprep.subr.bf16.mxu1 %v3395_v25  ;;  %v5197_v58 = vrot.slane %v4171_v32, %v3874_v10 }
 0x137   :  { %v1331_v61 = vmul.f32 %v5196_v2, %v4107_v23  ;;  %v3383_v18 = vpack.c.bf16 %v1330_v56, %v1299_v28  ;;  %v1394_v59 = vmul.f32 %v1386_v35, %v4153_v63  ;;  %3382 = vmatpush1.bf16.msra.mxu0 %v3381_v14  ;;  %3304 = vmatmul.mubr.msk.f32.vlgmr.msra.gmra.mrb[0].mxu1 %vm922_vm10, %v464_v19  ;;  %v1462_v14 = vld [vmem:[#allocation8 + $0x62] ss:$8 sm:$0xf] }
 0x138   :  { %v1298_v29 = vmul.f32 %v5197_v58, %v4073_v52  ;;  %v3399_v50 = vpack.c.bf16 %v1332_v38, %v1301_v22  ;;  %v5198_v23 = vrot.slane %v4171_v32, %v3879_v16  ;;  %v5199_v43 = vrot.slane %v4215_v15, %v3876_v11  ;;  %3398 = vmatpush1.bf16.msra.mxu1 %v3397_v0 }
 0x139   :  { %v1444_v56 = vrot.slane %v4284_v60, %v3879_v16  ;;  %3384 = vmatprep.subr.bf16.mxu0 %v3383_v18  ;;  %v5200_v63 = vrot.slane %v4215_v15, %v3881_v17  ;;  %1597 = vmatprep.mubr.f32.mxu0 %v5202_v31  ;;  %v5203_v7 = vrot.slane %v4249_v41, %v3879_v16 }
 0x13a   :  { %v1300_v8 = vmul.f32 %v5198_v23, %v4097_v5  ;;  %v1361_v39 = vmul.f32 %v5199_v43, %v4141_v51  ;;  %v3385_v52 = vpack.c.bf16 %v1329_v53, %v1298_v29  ;;  %v5201_v5 = vrot.slane %v4249_v41, %v3874_v10  ;;  %3400 = vmatprep.subr.bf16.mxu1 %v3399_v50 }
 0x13b   :  { %v1363_v35 = vmul.f32 %v5200_v63, %v4130_v46  ;;  %v1393_v4 = vmul.f32 %v5203_v7, %v4157_v1  ;;  %v1454_v57 = vmul.f32 %v1440_v21, %v4266_v45  ;;  %1668 = vmatprep.mubr.f32.mxu1 %v5202_v31  ;;  %v5204_v46 = vrot.slane %v4215_v15, %v3874_v10 }
 0x13c   :  { %v1391_v32 = vmul.f32 %v5201_v5, %v4134_v47  ;;  %v3401_v51 = vpack.c.bf16 %v1331_v61, %v1300_v8  ;;  %v3387_v36 = vpack.c.bf16 %v1392_v30, %v1361_v39  ;;  %v1405_v47 = vrot.slane %v4282_v27, %v3874_v10  ;;  %3386 = vmatpush1.bf16.msra.mxu0 %v3385_v52  ;;  %v1493_v61 = vld [vmem:[#allocation6 + $0x10] sm:$0xff] }
 0x13d   :  { %v1360_v42 = vmul.f32 %v5204_v46, %v4123_v40  ;;  %v1456_v38 = vmul.f32 %v1448_v34, %v4258_v48  ;;  %v3403_v24 = vpack.c.bf16 %v1394_v59, %v1363_v35  ;;  %v5205_v1 = vrot.slane %v4215_v15, %v3879_v16  ;;  %v2120_v5 = vld [vmem:[#allocation8 + $0x21] ss:$8 sm:$0xf] }
 0x13e   :  { %v1413_v45 = vrot.slane %v4282_v27, %v3879_v16  ;;  %v5206_v21 = vrot.slane %v4282_v27, %v3876_v11  ;;  %3388 = vmatprep.subr.bf16.mxu0 %v3387_v36  ;;  %3402 = vmatpush1.bf16.msra.mxu1 %v3401_v51  ;;  %v5207_v48 = vrot.slane %v4282_v27, %v3881_v17 }
 0x13f   :  { %v1362_v41 = vmul.f32 %v5205_v1, %v4147_v55  ;;  %v3389_v19 = vpack.c.bf16 %v1391_v32, %v1360_v42  ;;  %v5208_v55 = vrot.slane %v4284_v60, %v3874_v10  ;;  %3404 = vmatprep.subr.bf16.mxu1 %v3403_v24  ;;  %v1455_v28 = vmul.f32 %v1444_v56, %v4262_v44  ;;  %v2162_v32 = vld [vmem:[#allocation8 + $0x22] ss:$8 sm:$0xf] }
 0x140   :  { %v1423_v40 = vmul.f32 %v5206_v21, %v4235_v37  ;;  %v1425_v34 = vmul.f32 %v5207_v48, %v4222_v54  ;;  %v1471_v37 = vrot.slane %v1462_v14, %v3876_v11  ;;  %v1422_v0 = vmul.f32 %v1405_v47, %v4211_v13  ;;  %v5209_v54 = vld [vmem:[#allocation13_spill] sm:$0xff] }
 0x141   :  { %v1453_v15 = vmul.f32 %v5208_v55, %v4226_v49  ;;  %v3405_v3 = vpack.c.bf16 %v1393_v4, %v1362_v41  ;;  %v1479_v12 = vrot.slane %v1462_v14, %v3881_v17  ;;  %3390 = vmatpush1.bf16.msra.mxu0 %v3389_v19  ;;  %v1424_v22 = vmul.f32 %v1413_v45, %v5209_v54 }
 0x142   :  { %v3391_v25 = vpack.c.bf16 %v1454_v57, %v1423_v40  ;;  %v3407_v27 = vpack.c.bf16 %v1456_v38, %v1425_v34  ;;  %v1467_v49 = vrot.slane %v1462_v14, %v3874_v10  ;;  %v1475_v44 = vrot.slane %v1462_v14, %v3879_v16 }
 0x143   :  { %3406 = vmatpush1.bf16.msra.mxu1 %v3405_v3  ;;  %v3393_v60 = vpack.c.bf16 %v1453_v15, %v1422_v0  ;;  %v3409_v26 = vpack.c.bf16 %v1455_v28, %v1424_v22  ;;  %v1485_v53 = vmul.f32 %v1471_v37, %v4343_v62  ;;  %v1487_v2 = vmul.f32 %v1479_v12, %v4335_v20  ;;  %v1683_v20 = vpop.permute.xlu0 %1682  ;;  %v3259_v28 = vld [vmem:[%s5171_s4] sm:$0xff] }
 0x144   :  { %3392 = vmatprep.subr.bf16.mxu0 %v3391_v25  ;;  %3408 = vmatprep.subr.bf16.mxu1 %v3407_v27  ;;  %v1484_v13 = vmul.f32 %v1467_v49, %v4292_v33  ;;  %v1486_v30 = vmul.f32 %v1475_v44, %v4339_v6  ;;  %v2129_v4 = vrot.slane %v2120_v5, %v3876_v11 }
 0x145   :  { %3394 = vmatpush1.bf16.msra.mxu0 %v3393_v60  ;;  %v2171_v57 = vrot.slane %v2162_v32, %v3876_v11  ;;  %v2125_v46 = vrot.slane %v2120_v5, %v3874_v10  ;;  %v2137_v42 = vrot.slane %v2120_v5, %v3881_v17  ;;  %v2175_v38 = vrot.slane %v2162_v32, %v3879_v16 }
 0x146   :  { %1549 = vmatprep.subr.mxu0 %v1485_v53  ;;  %v2167_v41 = vrot.slane %v2162_v32, %v3874_v10  ;;  %v2179_v45 = vrot.slane %v2162_v32, %v3881_v17  ;;  %v2133_v55 = vrot.slane %v2120_v5, %v3879_v16  ;;  %v2318_v5 = vld [vmem:[#allocation8 + $0x26] ss:$8 sm:$0xf] }
 0x147   :  { %3410 = vmatpush1.bf16.msra.mxu1 %v3409_v26 }
 0x148   :  { %1620 = vmatprep.subr.mxu1 %v1487_v2 }
 0x149   :  { %1550 = vmatpush1.msra.mxu0 %v1484_v13 }
 0x14a   :  { %3305 = vmatmul.mubr.msk.f32.vlgmr.msra.gmra.mrb[0].mxu0 %vm922_vm10, %v1493_v61 }
 0x14b   :  { %1621 = vmatpush1.msra.mxu1 %v1486_v30  ;;  %2579 = vmatprep.mubr.f32.mxu0 %v5202_v31  ;;  %v2246_v30 = vld [vmem:[#allocation8 + $0x24] ss:$8 sm:$0xf] }
 0x14c   :  { %3306 = vmatmul.mubr.msk.f32.vlgmr.msra.gmra.mrb[0].mxu1 %vm922_vm10, %v1493_v61  ;;  %v2204_v61 = vld [vmem:[#allocation8 + $0x23] ss:$8 sm:$0xf] }
 0x14d   :  { %2650 = vmatprep.mubr.f32.mxu1 %v5202_v31 }
 0x21d   :  { %v1599_v62 = vpop.f32.mrb[0].mxu0 }
 0x21e   :  { %v1685_v18 = vadd.f32 %v1683_v20, %v1599_v62  ;;  %v1601_v58 = vpop.f32.mrb[1].mxu0 }
 0x21f   :  { %v1670_v29 = vpop.f32.mrb[0].mxu1  ;;  %v1686_v6 = vadd.f32 %v1683_v20, %v1601_v58  ;;  %v2255_v58 = vrot.slane %v2246_v30, %v3876_v11 }
 0x220   :  { %v1687_v33 = vadd.f32 %v1683_v20, %v1670_v29  ;;  %v1672_v59 = vpop.f32.mrb[1].mxu1  ;;  %v4451_v50 = vmax.f32 %v1685_v18, 0.0  ;;  %v2213_v18 = vrot.slane %v2204_v61, %v3876_v11 }
 0x221   :  { %v4459_v8 = vmax.f32 %v1686_v6, 0.0  ;;  %v1688_v43 = vadd.f32 %v1683_v20, %v1672_v59  ;;  %v2276_v6 = vld [vmem:[#allocation8 + $0x25] ss:$8 sm:$0xf] }
 0x222   :  { %v4453_v23 = vmax.f32 %v1687_v33, 0.0  ;;  %2108 = vrot.lane.b32.xlu1 %v4451_v50, %s3651_s12  ;;  %v2209_v33 = vrot.slane %v2204_v61, %v3874_v10 }
 0x223   :  { %v4465_v39 = vmax.f32 %v1688_v43, 0.0  ;;  %v2221_v43 = vrot.slane %v2204_v61, %v3881_v17 }
 0x224   :  { %2112 = vrot.lane.b32.xlu0 %v4453_v23, %s3651_s12 }
 0x226   :  { %2110 = vrot.lane.b32.xlu1 %v4459_v8, %s3651_s12 }
 0x228   :  { %2150 = vrot.lane.b32.xlu0 %v4451_v50, %s3646_s8 }
 0x22a   :  { %2114 = vrot.lane.b32.xlu1 %v4465_v39, %s3651_s12 }
 0x22c   :  { %2154 = vrot.lane.b32.xlu0 %v4453_v23, %s3646_s8 }
 0x22e   :  { %2152 = vrot.lane.b32.xlu1 %v4459_v8, %s3646_s8 }
 0x230   :  { %2192 = vrot.lane.b32.xlu0 %v4451_v50, %s3652_s5 }
 0x232   :  { %2156 = vrot.lane.b32.xlu1 %v4465_v39, %s3646_s8 }
 0x234   :  { %2196 = vrot.lane.b32.xlu0 %v4453_v23, %s3652_s5 }
 0x236   :  { %2194 = vrot.lane.b32.xlu1 %v4459_v8, %s3652_s5 }
 0x238   :  { %2234 = vrot.lane.b32.xlu0 %v4451_v50, %s3653_s13 }
 0x23a   :  { %2198 = vrot.lane.b32.xlu1 %v4465_v39, %s3652_s5 }
 0x23c   :  { %2238 = vrot.lane.b32.xlu0 %v4453_v23, %s3653_s13 }
 0x23e   :  { %2236 = vrot.lane.b32.xlu1 %v4459_v8, %s3653_s13 }
 0x240   :  { %2306 = vrot.lane.b32.xlu0 %v4451_v50, %s3654_s14 }
 0x242   :  { %2240 = vrot.lane.b32.xlu1 %v4465_v39, %s3653_s13 }
 0x244   :  { %2310 = vrot.lane.b32.xlu0 %v4453_v23, %s3654_s14 }
 0x246   :  { %2308 = vrot.lane.b32.xlu1 %v4459_v8, %s3654_s14 }
 0x248   :  { %2348 = vrot.lane.b32.xlu0 %v4451_v50, %s3655_s15 }
 0x24a   :  { %2312 = vrot.lane.b32.xlu1 %v4465_v39, %s3654_s14 }
 0x24c   :  { %2352 = vrot.lane.b32.xlu0 %v4453_v23, %s3655_s15 }
 0x24e   :  { %2350 = vrot.lane.b32.xlu1 %v4459_v8, %s3655_s15 }
 0x250   :  { %2390 = vrot.lane.b32.xlu0 %v4451_v50, %s3656_s16 }
 0x252   :  { %2354 = vrot.lane.b32.xlu1 %v4465_v39, %s3655_s15 }
 0x254   :  { %2394 = vrot.lane.b32.xlu0 %v4453_v23, %s3656_s16 }
 0x256   :  { %2392 = vrot.lane.b32.xlu1 %v4459_v8, %s3656_s16 }
 0x258   :  { %1693 = vrot.lane.b32.xlu0 %v4451_v50, %s3657_s17 }
 0x25a   :  { %2396 = vrot.lane.b32.xlu1 %v4465_v39, %s3656_s16 }
 0x25c   :  { %1697 = vrot.lane.b32.xlu0 %v4453_v23, %s3657_s17 }
 0x25e   :  { %1695 = vrot.lane.b32.xlu1 %v4459_v8, %s3657_s17 }
 0x260   :  { %1735 = vrot.lane.b32.xlu0 %v4451_v50, %s3658_s18 }
 0x262   :  { %1699 = vrot.lane.b32.xlu1 %v4465_v39, %s3657_s17 }
 0x264   :  { %1739 = vrot.lane.b32.xlu0 %v4453_v23, %s3658_s18 }
 0x266   :  { %1737 = vrot.lane.b32.xlu1 %v4459_v8, %s3658_s18 }
 0x268   :  { %2432 = vrot.lane.b32.xlu0 %v4451_v50, %s3660_s19 }
 0x26a   :  { %1741 = vrot.lane.b32.xlu1 %v4465_v39, %s3658_s18 }
 0x26c   :  { %2436 = vrot.lane.b32.xlu0 %v4453_v23, %s3660_s19 }
 0x26e   :  { %2434 = vrot.lane.b32.xlu1 %v4459_v8, %s3660_s19 }
 0x270   :  { %1777 = vrot.lane.b32.xlu0 %v4451_v50, %s3661_s20 }
 0x272   :  { %2438 = vrot.lane.b32.xlu1 %v4465_v39, %s3660_s19 }
 0x274   :  { %1781 = vrot.lane.b32.xlu0 %v4453_v23, %s3661_s20 }
 0x276   :  { %1779 = vrot.lane.b32.xlu1 %v4459_v8, %s3661_s20 }
 0x278   :  { %1819 = vrot.lane.b32.xlu0 %v4451_v50, %s3662_s21 }
 0x27a   :  { %1783 = vrot.lane.b32.xlu1 %v4465_v39, %s3661_s20 }
 0x27c   :  { %1823 = vrot.lane.b32.xlu0 %v4453_v23, %s3662_s21 }
 0x27e   :  { %1821 = vrot.lane.b32.xlu1 %v4459_v8, %s3662_s21 }
 0x280   :  { %1861 = vrot.lane.b32.xlu0 %v4451_v50, %s3663_s1 }
 0x282   :  { %1825 = vrot.lane.b32.xlu1 %v4465_v39, %s3662_s21 }
 0x284   :  { %1865 = vrot.lane.b32.xlu0 %v4453_v23, %s3663_s1 }
 0x286   :  { %1863 = vrot.lane.b32.xlu1 %v4459_v8, %s3663_s1 }
 0x288   :  { %1903 = vrot.lane.b32.xlu0 %v4451_v50, %s3664_s22 }
 0x28a   :  { %1867 = vrot.lane.b32.xlu1 %v4465_v39, %s3663_s1 }
 0x28c   :  { %1907 = vrot.lane.b32.xlu0 %v4453_v23, %s3664_s22 }
 0x28e   :  { %1905 = vrot.lane.b32.xlu1 %v4459_v8, %s3664_s22 }
 0x290   :  { %1945 = vrot.lane.b32.xlu0 %v4451_v50, %s3665_s23 }
 0x292   :  { %1909 = vrot.lane.b32.xlu1 %v4465_v39, %s3664_s22 }
 0x294   :  { %1949 = vrot.lane.b32.xlu0 %v4453_v23, %s3665_s23  ;;  %v2109_v56 = vpop.permute.xlu1 %2108 }
 0x296   :  { %v2113_v52 = vpop.permute.xlu0 %2112  ;;  %1947 = vrot.lane.b32.xlu1 %v4459_v8, %s3665_s23 }
 0x298   :  { %1987 = vrot.lane.b32.xlu0 %v4451_v50, %s3666_s24  ;;  %v2111_v63 = vpop.permute.xlu1 %2110 }
 0x299   :  { %v2118_v36 = vsel %vm509_vm0, %v2109_v56, %v2111_v63  ;;  %v2117_v15 = vsel %vm509_vm0, %v2111_v63, %v2113_v52 }
 0x29a   :  { %v2151_v35 = vpop.permute.xlu0 %2150  ;;  %1951 = vrot.lane.b32.xlu1 %v4465_v39, %s3665_s23  ;;  %v2143_v21 = vmul.f32 %v2129_v4, %v2118_v36  ;;  %v2144_v49 = vmul.f32 %v2133_v55, %v2117_v15  ;;  %v2263_v4 = vrot.slane %v2246_v30, %v3881_v17 }
 0x29c   :  { %1991 = vrot.lane.b32.xlu0 %v4453_v23, %s3666_s24  ;;  %v2115_v51 = vpop.permute.xlu1 %2114 }
 0x29d   :  { %v2116_v40 = vsel %vm509_vm0, %v2113_v52, %v2115_v51  ;;  %v2119_v19 = vsel %vm509_vm0, %v2115_v51, %v2109_v56  ;;  %v2259_v56 = vrot.slane %v2246_v30, %v3879_v16  ;;  %vm5210_vm0 = vcmp.lt.s32.totalorder %v3868_v9, 64 }
 0x29e   :  { %v2155_v7 = vpop.permute.xlu0 %2154  ;;  %1989 = vrot.lane.b32.xlu1 %v4459_v8, %s3666_s24  ;;  %v2142_v37 = vmul.f32 %v2125_v46, %v2119_v19  ;;  %v2145_v25 = vmul.f32 %v2137_v42, %v2116_v40  ;;  %v2281_v42 = vrot.slane %v2276_v6, %v3874_v10 }
 0x2a0   :  { %2029 = vrot.lane.b32.xlu0 %v4451_v50, %s3667_s25  ;;  %v2153_v47 = vpop.permute.xlu1 %2152 }
 0x2a1   :  { %v2160_v24 = vsel %vm553_vm1, %v2151_v35, %v2153_v47  ;;  %v2159_v34 = vsel %vm553_vm1, %v2153_v47, %v2155_v7 }
 0x2a2   :  { %v2193_v1 = vpop.permute.xlu0 %2192  ;;  %v2185_v48 = vmul.f32 %v2171_v57, %v2160_v24  ;;  %1993 = vrot.lane.b32.xlu1 %v4465_v39, %s3666_s24  ;;  %v2186_v54 = vmul.f32 %v2175_v38, %v2159_v34  ;;  %v2217_v57 = vrot.slane %v2204_v61, %v3879_v16 }
 0x2a4   :  { %2033 = vrot.lane.b32.xlu0 %v4453_v23, %s3667_s25  ;;  %v2157_v14 = vpop.permute.xlu1 %2156  ;;  %v3411_v3 = vpack.c.bf16 %v2185_v48, %v2143_v21  ;;  %v3429_v13 = vpack.c.bf16 %v2186_v54, %v2144_v49 }
 0x2a5   :  { %v2158_v0 = vsel %vm553_vm1, %v2155_v7, %v2157_v14  ;;  %v2161_v12 = vsel %vm553_vm1, %v2157_v14, %v2151_v35  ;;  %v2251_v35 = vrot.slane %v2246_v30, %v3874_v10  ;;  %vm5211_vm1 = vcmp.lt.s32.totalorder %v3868_v9, 63 }
 0x2a6   :  { %v2197_v27 = vpop.permute.xlu0 %2196  ;;  %v2184_v22 = vmul.f32 %v2167_v41, %v2161_v12  ;;  %v2187_v60 = vmul.f32 %v2179_v45, %v2158_v0  ;;  %2031 = vrot.lane.b32.xlu1 %v4459_v8, %s3667_s25  ;;  %3412 = vmatprep.subr.bf16.mxu0 %v3411_v3  ;;  %v2323_v41 = vrot.slane %v2318_v5, %v3874_v10 }
 0x2a7   :  { %v2285_v45 = vrot.slane %v2276_v6, %v3876_v11  ;;  %v2298_v0 = vmul.f32 %v2281_v42, %v4451_v50  ;;  %v2335_v50 = vrot.slane %v2318_v5, %v3881_v17 }
 0x2a8   :  { %3262 = vperm.xlu0 %3549, %v3259_v28   ;;  %v3413_v26 = vpack.c.bf16 %v2184_v22, %v2142_v37  ;;  %v2195_v44 = vpop.permute.xlu1 %2194  ;;  %v3427_v53 = vpack.c.bf16 %v2187_v60, %v2145_v25  ;;  %v2289_v28 = vrot.slane %v2276_v6, %v3879_v16  ;;  %v2293_v37 = vrot.slane %v2276_v6, %v3881_v17 }
 0x2a9   :  { %v2202_v29 = vsel %vm597_vm2, %v2193_v1, %v2195_v44  ;;  %v2201_v47 = vsel %vm597_vm2, %v2195_v44, %v2197_v27  ;;  %v2299_v54 = vmul.f32 %v2285_v45, %v4459_v8  ;;  %v2331_v44 = vrot.slane %v2318_v5, %v3879_v16 }
 0x2aa   :  { %v2235_v2 = vpop.permute.xlu0 %2234  ;;  %2035 = vrot.lane.b32.xlu1 %v4465_v39, %s3667_s25  ;;  %3414 = vmatpush1.bf16.msra.mxu0 %v3413_v26  ;;  %v2227_v32 = vmul.f32 %v2213_v18, %v2202_v29  ;;  %v2228_v3 = vmul.f32 %v2217_v57, %v2201_v47  ;;  %v2300_v18 = vmul.f32 %v2289_v28, %v4453_v23 }
 0x2ab   :  { %3428 = vmatprep.subr.bf16.mxu1 %v3427_v53 }
 0x2ac   :  { %3430 = vmatpush1.bf16.msra.mxu1 %v3429_v13  ;;  %v2199_v20 = vpop.permute.xlu1 %2198 }
 0x2ad   :  { %v2200_v36 = vsel %vm597_vm2, %v2197_v27, %v2199_v20  ;;  %v2203_v46 = vsel %vm597_vm2, %v2199_v20, %v2193_v1  ;;  %v2327_v1 = vrot.slane %v2318_v5, %v3876_v11  ;;  %vm5212_vm2 = vmmov %vm5210_vm0 }
 0x2ae   :  { %v2239_v62 = vpop.permute.xlu0 %2238  ;;  %v2226_v34 = vmul.f32 %v2209_v33, %v2203_v46  ;;  %v2229_v55 = vmul.f32 %v2221_v43, %v2200_v36  ;;  %v2301_v33 = vmul.f32 %v2293_v37, %v4465_v39 }
 0x2b0   :  { %v2237_v59 = vpop.permute.xlu1 %2236 }
 0x2b1   :  { %v2244_v52 = vsel %vm641_vm3, %v2235_v2, %v2237_v59  ;;  %v2243_v51 = vsel %vm641_vm3, %v2237_v59, %v2239_v62 }
 0x2b2   :  { %v2307_v63 = vpop.permute.xlu0 %2306  ;;  %v2269_v7 = vmul.f32 %v2255_v58, %v2244_v52  ;;  %v2270_v21 = vmul.f32 %v2259_v56, %v2243_v51  ;;  %v2360_v52 = vld [vmem:[#allocation8 + $0x27] ss:$8 sm:$0xf] }
 0x2b3   :  { %v2369_v23 = vrot.slane %v2360_v52, %v3876_v11  ;;  %v2373_v57 = vrot.slane %v2360_v52, %v3879_v16  ;;  %v2377_v36 = vrot.slane %v2360_v52, %v3881_v17 }
 0x2b4   :  { %v2241_v38 = vpop.permute.xlu1 %2240  ;;  %v3415_v24 = vpack.c.bf16 %v2269_v7, %v2227_v32  ;;  %v3433_v22 = vpack.c.bf16 %v2270_v21, %v2228_v3 }
 0x2b5   :  { %v2242_v40 = vsel %vm641_vm3, %v2239_v62, %v2241_v38  ;;  %v2245_v19 = vsel %vm641_vm3, %v2241_v38, %v2235_v2  ;;  %vm5213_vm3 = vmmov %vm5210_vm0 }
 0x2b6   :  { %v2311_v48 = vpop.permute.xlu0 %2310  ;;  %v2268_v15 = vmul.f32 %v2251_v35, %v2245_v19  ;;  %v2271_v14 = vmul.f32 %v2263_v4, %v2242_v40  ;;  %3416 = vmatprep.subr.bf16.mxu0 %v3415_v24  ;;  %v2402_v35 = vld [vmem:[#allocation8 + $0x40] ss:$8 sm:$0xf] }
 0x2b7   :  { %v2407_v51 = vrot.slane %v2402_v35, %v3874_v10  ;;  %v2411_v7 = vrot.slane %v2402_v35, %v3876_v11  ;;  %v2415_v24 = vrot.slane %v2402_v35, %v3879_v16 }
 0x2b8   :  { %v3417_v25 = vpack.c.bf16 %v2268_v15, %v2226_v34  ;;  %v2309_v12 = vpop.permute.xlu1 %2308  ;;  %v3431_v27 = vpack.c.bf16 %v2271_v14, %v2229_v55 }
 0x2b9   :  { %v2315_v60 = vsel %vm716_vm4, %v2309_v12, %v2311_v48  ;;  %v2316_v49 = vsel %vm716_vm4, %v2307_v63, %v2309_v12 }
 0x2ba   :  { %v2349_v26 = vpop.permute.xlu0 %2348  ;;  %v2340_v53 = vmul.f32 %v2323_v41, %v2316_v49  ;;  %v2341_v2 = vmul.f32 %v2327_v1, %v2315_v60  ;;  %3418 = vmatpush1.bf16.msra.mxu0 %v3417_v25  ;;  %3432 = vmatprep.subr.bf16.mxu1 %v3431_v27  ;;  %v2419_v41 = vrot.slane %v2402_v35, %v3881_v17 }
 0x2bb   :  { %3434 = vmatpush1.bf16.msra.mxu1 %v3433_v22 }
 0x2bc   :  { %v3421_v13 = vpack.c.bf16 %v2340_v53, %v2298_v0  ;;  %v2313_v61 = vpop.permute.xlu1 %2312  ;;  %v3419_v8 = vpack.c.bf16 %v2341_v2, %v2299_v54  ;;  %v1747_v53 = vld [vmem:[#allocation8 + $0x1] ss:$8 sm:$0xf] }
 0x2bd   :  { %v2314_v30 = vsel %vm716_vm4, %v2311_v48, %v2313_v61  ;;  %v2317_v20 = vsel %vm716_vm4, %v2313_v61, %v2307_v63  ;;  %v2365_v63 = vrot.slane %v2360_v52, %v3874_v10  ;;  %v1756_v61 = vrot.slane %v1747_v53, %v3876_v11  ;;  %vm5214_vm4 = vmmov %vm5211_vm1 }
 0x2be   :  { %v2353_v62 = vpop.permute.xlu0 %2352  ;;  %v2342_v58 = vmul.f32 %v2331_v44, %v2314_v30  ;;  %v2343_v29 = vmul.f32 %v2335_v50, %v2317_v20  ;;  %3420 = vmatprep.subr.bf16.mxu0 %v3419_v8  ;;  %v1705_v50 = vld [vmem:[#allocation8] ss:$8 sm:$0xf]  ;;  %v1764_v52 = vrot.slane %v1747_v53, %v3881_v17 }
 0x2bf   :  { %3422 = vmatpush1.bf16.msra.mxu0 %v3421_v13  ;;  %v2444_v13 = vld [vmem:[#allocation8 + $0x41] ss:$8 sm:$0xf]  ;;  %v1714_v30 = vrot.slane %v1705_v50, %v3876_v11 }
 0x2c0   :  { %v3437_v59 = vpack.c.bf16 %v2342_v58, %v2300_v18  ;;  %v2351_v6 = vpop.permute.xlu1 %2350  ;;  %v3435_v43 = vpack.c.bf16 %v2343_v29, %v2301_v33  ;;  %v1710_v58 = vrot.slane %v1705_v50, %v3874_v10  ;;  %v2449_v33 = vrot.slane %v2444_v13, %v3874_v10 }
 0x2c1   :  { %v2357_v39 = vsel %vm760_vm6, %v2351_v6, %v2353_v62  ;;  %v2358_v4 = vsel %vm760_vm6, %v2349_v26, %v2351_v6 }
 0x2c2   :  { %v2391_v56 = vpop.permute.xlu0 %2390  ;;  %3436 = vmatprep.subr.bf16.mxu1 %v3435_v43  ;;  %v2382_v45 = vmul.f32 %v2365_v63, %v2358_v4  ;;  %v2383_v21 = vmul.f32 %v2369_v23, %v2357_v39  ;;  %v1722_v43 = vrot.slane %v1705_v50, %v3881_v17  ;;  %v2457_v63 = vrot.slane %v2444_v13, %v3879_v16 }
 0x2c3   :  { %3438 = vmatpush1.bf16.msra.mxu1 %v3437_v59  ;;  %v2453_v59 = vrot.slane %v2444_v13, %v3876_v11  ;;  %v2461_v23 = vrot.slane %v2444_v13, %v3881_v17 }
 0x2c4   :  { %v2355_v5 = vpop.permute.xlu1 %2354 }
 0x2c5   :  { %v2356_v48 = vsel %vm760_vm6, %v2353_v62, %v2355_v5  ;;  %v2359_v1 = vsel %vm760_vm6, %v2355_v5, %v2349_v26  ;;  %v1752_v62 = vrot.slane %v1747_v53, %v3874_v10  ;;  %vm5216_vm6 = vmmov %vm5211_vm1 }
 0x2c6   :  { %v2395_v32 = vpop.permute.xlu0 %2394  ;;  %v2384_v37 = vmul.f32 %v2373_v57, %v2356_v48  ;;  %v2385_v25 = vmul.f32 %v2377_v36, %v2359_v1 }
 0x2c8   :  { %v2393_v46 = vpop.permute.xlu1 %2392 }
 0x2c9   :  { %v2399_v42 = vsel %vm804_vm5, %v2393_v46, %v2395_v32  ;;  %v2400_v47 = vsel %vm804_vm5, %v2391_v56, %v2393_v46 }
 0x2ca   :  { %v1694_v38 = vpop.permute.xlu0 %1693  ;;  %v2424_v40 = vmul.f32 %v2407_v51, %v2400_v47  ;;  %v2425_v19 = vmul.f32 %v2411_v7, %v2399_v42 }
 0x2cc   :  { %v3425_v34 = vpack.c.bf16 %v2424_v40, %v2382_v45  ;;  %v2397_v55 = vpop.permute.xlu1 %2396  ;;  %v3423_v15 = vpack.c.bf16 %v2425_v19, %v2383_v21  ;;  %v1718_v45 = vrot.slane %v1705_v50, %v3879_v16 }
 0x2cd   :  { %v2398_v14 = vsel %vm804_vm5, %v2395_v32, %v2397_v55  ;;  %v2401_v3 = vsel %vm804_vm5, %v2397_v55, %v2391_v56  ;;  %v1760_v56 = vrot.slane %v1747_v53, %v3879_v16  ;;  %vm5215_vm5 = vmmov %vm5210_vm0 }
 0x2ce   :  { %v1698_v28 = vpop.permute.xlu0 %1697  ;;  %v2426_v0 = vmul.f32 %v2415_v24, %v2398_v14  ;;  %v2427_v12 = vmul.f32 %v2419_v41, %v2401_v3  ;;  %3424 = vmatprep.subr.bf16.mxu0 %v3423_v15  ;;  %v3307_v41 = vld [vmem:[%s5170_s3 + $0x8] sm:$0xff] }
 0x2cf   :  { %3426 = vmatpush1.bf16.msra.mxu0 %v3425_v34 }
 0x2d0   :  { %v3441_v27 = vpack.c.bf16 %v2426_v0, %v2384_v37  ;;  %v1696_v54 = vpop.permute.xlu1 %1695  ;;  %v3439_v22 = vpack.c.bf16 %v2427_v12, %v2385_v25 }
 0x2d1   :  { %v4706_v6 = vsel %vm77_vm7, %v1694_v38, %v1696_v54  ;;  %v4743_v21 = vsel %vm77_vm7, %v1696_v54, %v1698_v28 }
 0x2d2   :  { %v1736_v60 = vpop.permute.xlu0 %1735  ;;  %3440 = vmatprep.subr.bf16.mxu1 %v3439_v22  ;;  %v1728_v36 = vmul.f32 %v1714_v30, %v4706_v6  ;;  %v1729_v25 = vmul.f32 %v1718_v45, %v4743_v21  ;;  %v1789_v22 = vld [vmem:[#allocation8 + $0x2] ss:$8 sm:$0xf] }
 0x2d3   :  { %3442 = vmatpush1.bf16.msra.mxu1 %v3441_v27  ;;  %v1794_v50 = vrot.slane %v1789_v22, %v3874_v10 }
 0x2d4   :  { %v1700_v49 = vpop.permute.xlu1 %1699 }
 0x2d5   :  { %v4713_v35 = vsel %vm77_vm7, %v1700_v49, %v1694_v38  ;;  %v4730_v46 = vsel %vm77_vm7, %v1698_v28, %v1700_v49  ;;  %vm5217_vm7 = vmmov %vm5211_vm1 }
 0x2d6   :  { %v1740_v26 = vpop.permute.xlu0 %1739  ;;  %v1727_v38 = vmul.f32 %v1710_v58, %v4713_v35  ;;  %v1730_v1 = vmul.f32 %v1722_v43, %v4730_v46 }
 0x2d8   :  { %v1738_v44 = vpop.permute.xlu1 %1737 }
 0x2d9   :  { %v4694_v20 = vsel %vm120_vm8, %v1736_v60, %v1738_v44  ;;  %v4735_v24 = vsel %vm120_vm8, %v1738_v44, %v1740_v26  ;;  %v1798_v44 = vrot.slane %v1789_v22, %v3876_v11 }
 0x2da   :  { %v2433_v2 = vpop.permute.xlu0 %2432  ;;  %v1770_v5 = vmul.f32 %v1756_v61, %v4694_v20  ;;  %v1771_v3 = vmul.f32 %v1760_v56, %v4735_v24  ;;  %v1806_v61 = vrot.slane %v1789_v22, %v3881_v17 }
 0x2dc   :  { %v1742_v8 = vpop.permute.xlu1 %1741  ;;  %v3443_v48 = vpack.c.bf16 %v1770_v5, %v1728_v36  ;;  %v3461_v54 = vpack.c.bf16 %v1771_v3, %v1729_v25  ;;  %v1802_v5 = vrot.slane %v1789_v22, %v3879_v16 }
 0x2dd   :  { %v4700_v29 = vsel %vm120_vm8, %v1742_v8, %v1736_v60  ;;  %v4720_v51 = vsel %vm120_vm8, %v1740_v26, %v1742_v8  ;;  %v1831_v60 = vld [vmem:[#allocation8 + $0x3] ss:$8 sm:$0xf] }
 0x2de   :  { %v2437_v18 = vpop.permute.xlu0 %2436  ;;  %v1769_v7 = vmul.f32 %v1752_v62, %v4700_v29  ;;  %v1772_v40 = vmul.f32 %v1764_v52, %v4720_v51  ;;  %v1840_v53 = vrot.slane %v1831_v60, %v3876_v11  ;;  %v1844_v8 = vrot.slane %v1831_v60, %v3879_v16 }
 0x2df   :  { %v1848_v43 = vrot.slane %v1831_v60, %v3881_v17 }
 0x2e0   :  { %v2435_v32 = vpop.permute.xlu1 %2434  ;;  %v3445_v34 = vpack.c.bf16 %v1769_v7, %v1727_v38  ;;  %v3459_v12 = vpack.c.bf16 %v1772_v40, %v1730_v1 }
 0x2e1   :  { %v2441_v39 = vsel %vm848_vm9, %v2435_v32, %v2437_v18  ;;  %v2442_v4 = vsel %vm848_vm9, %v2433_v2, %v2435_v32 }
 0x2e2   :  { %v1778_v57 = vpop.permute.xlu0 %1777  ;;  %v2466_v42 = vmul.f32 %v2449_v33, %v2442_v4  ;;  %v2467_v47 = vmul.f32 %v2453_v59, %v2441_v39 }
 0x2e4   :  { %v2439_v19 = vpop.permute.xlu1 %2438  ;;  %2531 = vmatprep.subr.mxu0 %v2467_v47 }
 0x2e5   :  { %v2440_v55 = vsel %vm848_vm9, %v2437_v18, %v2439_v19  ;;  %v2443_v15 = vsel %vm848_vm9, %v2439_v19, %v2433_v2  ;;  %2532 = vmatpush1.msra.mxu0 %v2466_v42  ;;  %v1836_v18 = vrot.slane %v1831_v60, %v3874_v10 }
 0x2e6   :  { %v1782_v14 = vpop.permute.xlu0 %1781  ;;  %v2468_v28 = vmul.f32 %v2457_v63, %v2440_v55  ;;  %v2469_v37 = vmul.f32 %v2461_v23, %v2443_v15  ;;  %3444 = vmatprep.subr.bf16.mxu0 %v3443_v48  ;;  %3308 = vmatmul.mubr.msk.f32.vlgmr.msra.gmra.mrb[2].mxu0 %vm922_vm10, %v3307_v41  ;;  %v1915_v55 = vld [vmem:[#allocation8 + $0x5] ss:$8 sm:$0xf] }
 0x2e7   :  { %3446 = vmatpush1.bf16.msra.mxu0 %v3445_v34  ;;  %2724 = vmatprep.mubr.f32.mxu0 %v5202_v31  ;;  %v1873_v34 = vld [vmem:[#allocation8 + $0x4] ss:$8 sm:$0xf]  ;;  %v1920_v60 = vrot.slane %v1915_v55, %v3874_v10 }
 0x2e8   :  { %2602 = vmatprep.subr.mxu1 %v2469_v37  ;;  %v1780_v0 = vpop.permute.xlu1 %1779  ;;  %v1882_v3 = vrot.slane %v1873_v34, %v3876_v11  ;;  %v1878_v25 = vrot.slane %v1873_v34, %v3874_v10 }
 0x2e9   :  { %2603 = vmatpush1.msra.mxu1 %v2468_v28  ;;  %v4761_v2 = vsel %vm164_vm11, %v1778_v57, %v1780_v0  ;;  %v4789_v23 = vsel %vm164_vm11, %v1780_v0, %v1782_v14  ;;  %v1924_v28 = vrot.slane %v1915_v55, %v3876_v11 }
 0x2ea   :  { %v1820_v27 = vpop.permute.xlu0 %1819  ;;  %3460 = vmatprep.subr.bf16.mxu1 %v3459_v12  ;;  %3309 = vmatmul.mubr.msk.f32.vlgmr.msra.gmra.mrb[2].mxu1 %vm922_vm10, %v3307_v41  ;;  %v1812_v58 = vmul.f32 %v1798_v44, %v4761_v2  ;;  %v1813_v41 = vmul.f32 %v1802_v5, %v4789_v23  ;;  %v1890_v12 = vrot.slane %v1873_v34, %v3881_v17 }
 0x2eb   :  { %3462 = vmatpush1.bf16.msra.mxu1 %v3461_v54  ;;  %2795 = vmatprep.mubr.f32.mxu1 %v5202_v31 }
 0x2ec   :  { %v1784_v49 = vpop.permute.xlu1 %1783 }
 0x2ed   :  { %v4774_v33 = vsel %vm164_vm11, %v1784_v49, %v1778_v57  ;;  %v4780_v56 = vsel %vm164_vm11, %v1782_v14, %v1784_v49 }
 0x2ee   :  { %v1824_v26 = vpop.permute.xlu0 %1823  ;;  %v1811_v7 = vmul.f32 %v1794_v50, %v4774_v33  ;;  %v1814_v36 = vmul.f32 %v1806_v61, %v4780_v56  ;;  %v1886_v61 = vrot.slane %v1873_v34, %v3879_v16  ;;  %v4865_v34 = vld [vmem:[#allocation8 + $0x6] ss:$8 sm:$0xf] }
 0x2f0   :  { %v1822_v13 = vpop.permute.xlu1 %1821 }
 0x2f1   :  { %v4768_v30 = vsel %vm208_vm12, %v1820_v27, %v1822_v13  ;;  %v4784_v52 = vsel %vm208_vm12, %v1822_v13, %v1824_v26 }
 0x2f2   :  { %v1862_v62 = vpop.permute.xlu0 %1861  ;;  %v1854_v59 = vmul.f32 %v1840_v53, %v4768_v30  ;;  %v1855_v42 = vmul.f32 %v1844_v8, %v4784_v52  ;;  %v1932_v53 = vrot.slane %v1915_v55, %v3881_v17 }
 0x2f4   :  { %v1826_v32 = vpop.permute.xlu1 %1825  ;;  %v3447_v63 = vpack.c.bf16 %v1854_v59, %v1812_v58  ;;  %v3465_v1 = vpack.c.bf16 %v1855_v42, %v1813_v41 }
 0x2f5   :  { %v4794_v39 = vsel %vm208_vm12, %v1824_v26, %v1826_v32  ;;  %v4798_v4 = vsel %vm208_vm12, %v1826_v32, %v1820_v27  ;;  %v1928_v27 = vrot.slane %v1915_v55, %v3879_v16  ;;  %v1999_v55 = vld [vmem:[#allocation8 + $0x7] ss:$8 sm:$0xf] }
 0x2f6   :  { %v1866_v57 = vpop.permute.xlu0 %1865  ;;  %v1853_v47 = vmul.f32 %v1836_v18, %v4798_v4  ;;  %v1856_v38 = vmul.f32 %v1848_v43, %v4794_v39  ;;  %3448 = vmatprep.subr.bf16.mxu0 %v3447_v63 }
 0x2f8   :  { %v3449_v45 = vpack.c.bf16 %v1853_v47, %v1811_v7  ;;  %v1864_v40 = vpop.permute.xlu1 %1863  ;;  %v3463_v19 = vpack.c.bf16 %v1856_v38, %v1814_v36  ;;  %v4856_v36 = vld [vmem:[#allocation8 + $0x42] ss:$8 sm:$0xf] }
 0x2f9   :  { %v4809_v37 = vsel %vm5210_vm0, %v1862_v62, %v1864_v40  ;;  %v5229_v9 = vrot.slane %v4856_v36, %v3879_v16 }
 0x2fa   :  { %v1904_v48 = vpop.permute.xlu0 %1903  ;;  %3450 = vmatpush1.bf16.msra.mxu0 %v3449_v45  ;;  %3464 = vmatprep.subr.bf16.mxu1 %v3463_v19  ;;  %v1896_v49 = vmul.f32 %v1882_v3, %v4809_v37  ;;  %v4859_v45 = vld [vmem:[#allocation8 + $0x43] ss:$8 sm:$0xf]  ;;  %v4861_v19 = vld [vmem:[#allocation8 + $0x44] ss:$8 sm:$0xf] }
 0x2fb   :  { %3466 = vmatpush1.bf16.msra.mxu1 %v3465_v1 }
 0x2fc   :  { %v1868_v15 = vpop.permute.xlu1 %1867 }
 0x2fd   :  { %v4824_v26 = vsel %vm5212_vm2, %v1868_v15, %v1862_v62  ;;  %v4830_v50 = vsel %vm5213_vm3, %v1866_v57, %v1868_v15  ;;  %v4839_v62 = vsel %vm5215_vm5, %v1864_v40, %v1866_v57 }
 0x2fe   :  { %v1908_v14 = vpop.permute.xlu0 %1907  ;;  %v1895_v58 = vmul.f32 %v1878_v25, %v4824_v26  ;;  %v1898_v32 = vmul.f32 %v1890_v12, %v4830_v50  ;;  %v1897_v42 = vmul.f32 %v1886_v61, %v4839_v62  ;;  %v4875_v25 = vld [vmem:[#allocation8 + $0x45] ss:$8 sm:$0xf] }
 0x300   :  { %v1906_v0 = vpop.permute.xlu1 %1905 }
 0x301   :  { %v4816_v54 = vsel %vm5211_vm1, %v1904_v48, %v1906_v0  ;;  %v4834_v13 = vsel %vm5214_vm4, %v1906_v0, %v1908_v14 }
 0x302   :  { %v4818_v22 = vpop.permute.xlu0 %1945  ;;  %v1938_v44 = vmul.f32 %v1924_v28, %v4816_v54  ;;  %v1939_v63 = vmul.f32 %v1928_v27, %v4834_v13  ;;  %v4952_v28 = vld [vmem:[#allocation8 + $0x60] ss:$8 sm:$0xf] }
 0x304   :  { %v1910_v8 = vpop.permute.xlu1 %1909  ;;  %v3451_v18 = vpack.c.bf16 %v1938_v44, %v1896_v49  ;;  %v4885_v44 = vld [vmem:[#allocation8 + $0x46] ss:$8 sm:$0xf]  ;;  %v1974_v49 = vrot.slane %v4865_v34, %v3881_v17 }
 0x305   :  { %v4844_v59 = vsel %vm5216_vm6, %v1908_v14, %v1910_v8  ;;  %v4848_v43 = vsel %vm5217_vm7, %v1910_v8, %v1904_v48  ;;  %v3469_v48 = vpack.c.bf16 %v1939_v63, %v1897_v42  ;;  %v1966_v8 = vrot.slane %v4865_v34, %v3876_v11 }
 0x306   :  { %v4850_v5 = vpop.permute.xlu0 %1949  ;;  %v1937_v7 = vmul.f32 %v1920_v60, %v4848_v43  ;;  %v1940_v57 = vmul.f32 %v1932_v53, %v4844_v59  ;;  %3452 = vmatprep.subr.bf16.mxu0 %v3451_v18  ;;  %v2008_v18 = vrot.slane %v1999_v55, %v3876_v11  ;;  %v2004_v42 = vrot.slane %v1999_v55, %v3874_v10  ;;  %v4921_v53 = vld [vmem:[#allocation8 + $0x20] ss:$8 sm:$0xf] }
 0x307   :  { %v2016_v63 = vrot.slane %v1999_v55, %v3881_v17  ;;  %v2050_v27 = vrot.slane %v4921_v53, %v3876_v11 }
 0x308   :  { %v3453_v47 = vpack.c.bf16 %v1937_v7, %v1895_v58  ;;  %v1948_v38 = vpop.permute.xlu1 %1947  ;;  %v3467_v41 = vpack.c.bf16 %v1940_v57, %v1898_v32  ;;  %v2012_v32 = vrot.slane %v1999_v55, %v3879_v16  ;;  %v1970_v55 = vrot.slane %v4865_v34, %v3879_v16 }
 0x309   :  { %v4903_v7 = vsel %vm340_vm15, %v4818_v22, %v1948_v38 }
 0x30a   :  { %v1988_v40 = vpop.permute.xlu0 %1987  ;;  %3454 = vmatpush1.bf16.msra.mxu0 %v3453_v47  ;;  %3468 = vmatprep.subr.bf16.mxu1 %v3467_v41  ;;  %5218 = vst [vmem:[#allocation13_spill] sm:$0xff] %v4903_v7  ;;  %v1980_v47 = vmul.f32 %v1966_v8, %v4903_v7 }
 0x30b   :  { %3470 = vmatpush1.bf16.msra.mxu1 %v3469_v48  ;;  %v1962_v48 = vrot.slane %v4865_v34, %v3874_v10 }
 0x30c   :  { %v1952_v0 = vpop.permute.xlu1 %1951 }
 0x30d   :  { %v4927_v41 = vsel %vm340_vm15, %v1952_v0, %v4818_v22  ;;  %v4938_v15 = vsel %vm340_vm15, %v4850_v5, %v1952_v0  ;;  %v4957_v0 = vsel %vm340_vm15, %v1948_v38, %v4850_v5 }
 0x30e   :  { %v1992_v57 = vpop.permute.xlu0 %1991  ;;  %5219 = vst [vmem:[#allocation14_spill] sm:$0xff] %v4938_v15 }
 0x310   :  { %v1990_v61 = vpop.permute.xlu1 %1989 }
 0x311   :  { %v4918_v58 = vsel %vm384_vm14, %v1988_v40, %v1990_v61  ;;  %v4942_v8 = vsel %vm384_vm14, %v1990_v61, %v1992_v57  ;;  %v1979_v61 = vmul.f32 %v1962_v48, %v4927_v41 }
 0x312   :  { %v2022_v14 = vmul.f32 %v2008_v18, %v4918_v58  ;;  %v4946_v18 = vld [vmem:[#allocation8 + $0x47] ss:$8 sm:$0xf]  ;;  %v2030_v22 = vpop.permute.xlu0 %2029  ;;  %v2023_v1 = vmul.f32 %v2012_v32, %v4942_v8  ;;  %v1981_v32 = vmul.f32 %v1970_v55, %v4957_v0  ;;  %v2046_v55 = vrot.slane %v4921_v53, %v3874_v10 }
 0x314   :  { %v1994_v3 = vpop.permute.xlu1 %1993  ;;  %v3455_v60 = vpack.c.bf16 %v2022_v14, %v1980_v47  ;;  %v1982_v14 = vmul.f32 %v1974_v49, %v4938_v15  ;;  %v4969_v47 = vld [vmem:[#allocation8 + $0x61] ss:$8 sm:$0xf] }
 0x315   :  { %v4962_v12 = vsel %vm384_vm14, %v1992_v57, %v1994_v3  ;;  %v4966_v34 = vsel %vm384_vm14, %v1994_v3, %v1988_v40  ;;  %v2961_v57 = vrot.slane %v4946_v18, %v3876_v11  ;;  %v2969_v3 = vrot.slane %v4946_v18, %v3881_v17 }
 0x316   :  { %5220 = vst [vmem:[#allocation15_spill] sm:$0xff] %v4962_v12  ;;  %v2021_v5 = vmul.f32 %v2004_v42, %v4966_v34  ;;  %v2024_v38 = vmul.f32 %v2016_v63, %v4962_v12  ;;  %3456 = vmatprep.subr.bf16.mxu0 %v3455_v60  ;;  %v3021_v40 = vrot.slane %v4969_v47, %v3876_v11 }
 0x317   :  { %v3473_v12 = vpack.c.bf16 %v2023_v1, %v1981_v32  ;;  %v3029_v1 = vrot.slane %v4969_v47, %v3881_v17  ;;  %v2054_v32 = vrot.slane %v4921_v53, %v3879_v16 }
 0x318   :  { %v3457_v42 = vpack.c.bf16 %v2021_v5, %v1979_v61  ;;  %v2032_v63 = vpop.permute.xlu1 %2031  ;;  %v3471_v60 = vpack.c.bf16 %v2024_v38, %v1982_v14  ;;  %v2058_v61 = vrot.slane %v4921_v53, %v3881_v17  ;;  %v5221_v14 = vrot.slane %v4856_v36, %v3874_v10 }
 0x319   :  { %v4993_v7 = vsel %vm428_vm13, %v2030_v22, %v2032_v63  ;;  %v5222_v38 = vrot.slane %v4859_v45, %v3876_v11  ;;  %v5225_v53 = vrot.slane %v4856_v36, %v3876_v11 }
 0x31a   :  { %v2064_v49 = vmul.f32 %v2050_v27, %v4993_v7  ;;  %3458 = vmatpush1.bf16.msra.mxu0 %v3457_v42  ;;  %v2824_v5 = vmul.f32 %v5221_v14, %v4706_v6  ;;  %v2034_v27 = vpop.permute.xlu0 %2033  ;;  %3472 = vmatprep.subr.bf16.mxu1 %v3471_v60  ;;  %v5223_v42 = vrot.slane %v4859_v45, %v3874_v10 }
 0x31b   :  { %v2855_v15 = vmul.f32 %v5222_v38, %v4735_v24  ;;  %v5224_v6 = vrot.slane %v4859_v45, %v3881_v17  ;;  %v5022_v24 = vsel %vm428_vm13, %v2032_v63, %v2034_v27  ;;  %3474 = vmatpush1.bf16.msra.mxu1 %v3473_v12  ;;  %v2825_v60 = vmul.f32 %v5225_v53, %v4743_v21 }
 0x31c   :  { %v2854_v48 = vmul.f32 %v5223_v42, %v4694_v20  ;;  %v2036_v38 = vpop.permute.xlu1 %2035  ;;  %2676 = vmatprep.subr.mxu0 %v2064_v49  ;;  %v5226_v20 = vrot.slane %v4859_v45, %v3879_v16  ;;  %v5227_v12 = vrot.slane %v4856_v36, %v3881_v17  ;;  %v5228_v21 = vrot.slane %v4875_v25, %v3876_v11 }
 0x31d   :  { %v2857_v14 = vmul.f32 %v5224_v6, %v4700_v29  ;;  %v5034_v29 = vsel %vm428_vm13, %v2034_v27, %v2036_v38  ;;  %v5038_v63 = vsel %vm428_vm13, %v2036_v38, %v2030_v22  ;;  %v2826_v22 = vmul.f32 %v5229_v9, %v4730_v46 }
 0x31e   :  { %v2856_v42 = vmul.f32 %v5226_v20, %v4720_v51  ;;  %v2827_v49 = vmul.f32 %v5227_v12, %v4713_v35  ;;  %v2915_v6 = vmul.f32 %v5228_v21, %v4784_v52  ;;  %v2063_v51 = vmul.f32 %v2046_v55, %v5038_v63  ;;  %v2071_v52 = vld [vmem:[%s5170_s3] sm:$0xff] }
 0x31f   :  { %v2066_v45 = vmul.f32 %v2058_v61, %v5034_v29  ;;  %v5230_v27 = vrot.slane %v4875_v25, %v3881_v17  ;;  %v2065_v35 = vmul.f32 %v2054_v32, %v5022_v24  ;;  %v3475_v53 = vpack.c.bf16 %v2855_v15, %v2825_v60 }
 0x320   :  { %v3477_v55 = vpack.c.bf16 %v2854_v48, %v2824_v5  ;;  %v5231_v61 = vrot.slane %v4861_v19, %v3876_v11  ;;  %2677 = vmatpush1.msra.mxu0 %v2063_v51  ;;  %v3491_v46 = vpack.c.bf16 %v2857_v14, %v2827_v49  ;;  %v3493_v36 = vpack.c.bf16 %v2856_v42, %v2826_v22 }
 0x321   :  { %v2917_v38 = vmul.f32 %v5230_v27, %v4798_v4  ;;  %2747 = vmatprep.subr.mxu1 %v2066_v45  ;;  %v5232_v4 = vrot.slane %v4861_v19, %v3881_v17  ;;  %v5233_v15 = vrot.slane %v4875_v25, %v3874_v10  ;;  %3476 = vmatprep.subr.bf16.mxu0 %v3475_v53  ;;  %v5246_v53 = vld [vmem:[#allocation15_spill] sm:$0xff] }
 0x322   :  { %v2885_v20 = vmul.f32 %v5231_v61, %v4789_v23  ;;  %2748 = vmatpush1.msra.mxu1 %v2065_v35  ;;  %v5234_v23 = vrot.slane %v4875_v25, %v3879_v16  ;;  %v2975_v5 = vmul.f32 %v2961_v57, %v4834_v13  ;;  %3310 = vmatmul.mubr.msk.f32.vlgmr.msra.gmra.mrb[2].mxu0 %vm922_vm10, %v2071_v52  ;;  %v5247_v61 = vld [vmem:[#allocation13_spill] sm:$0xff] }
 0x323   :  { %v2887_v32 = vmul.f32 %v5232_v4, %v4774_v33  ;;  %v2914_v60 = vmul.f32 %v5233_v15, %v4768_v30  ;;  %3492 = vmatprep.subr.bf16.mxu1 %v3491_v46  ;;  %v5235_v33 = vrot.slane %v4861_v19, %v3874_v10  ;;  %v2977_v30 = vmul.f32 %v2969_v3, %v4848_v43 }
 0x324   :  { %v2916_v48 = vmul.f32 %v5234_v23, %v4794_v39  ;;  %v3479_v14 = vpack.c.bf16 %v2915_v6, %v2885_v20  ;;  %3478 = vmatpush1.bf16.msra.mxu0 %v3477_v55  ;;  %3311 = vmatmul.mubr.msk.f32.vlgmr.msra.gmra.mrb[2].mxu1 %vm922_vm10, %v2071_v52  ;;  %v5236_v39 = vrot.slane %v4861_v19, %v3879_v16 }
 0x325   :  { %v2884_v42 = vmul.f32 %v5235_v33, %v4761_v2  ;;  %v3495_v12 = vpack.c.bf16 %v2917_v38, %v2887_v32  ;;  %v5237_v25 = vrot.slane %v4885_v44, %v3876_v11  ;;  %v3025_v49 = vrot.slane %v4969_v47, %v3879_v16  ;;  %3494 = vmatpush1.bf16.msra.mxu1 %v3493_v36 }
 0x326   :  { %v2886_v13 = vmul.f32 %v5236_v39, %v4780_v56  ;;  %3480 = vmatprep.subr.bf16.mxu0 %v3479_v14  ;;  %v5238_v43 = vrot.slane %v4885_v44, %v3881_v17  ;;  %v5239_v56 = vrot.slane %v4946_v18, %v3874_v10  ;;  %3177 = vmatprep.mubr.f32.mxu0 %v5202_v31  ;;  %v3271_v14 = vld [vmem:[#allocation3 + $0x10] sm:$0xff] }
 0x327   :  { %v2945_v57 = vmul.f32 %v5237_v25, %v4839_v62  ;;  %v3481_v2 = vpack.c.bf16 %v2914_v60, %v2884_v42  ;;  %3496 = vmatprep.subr.bf16.mxu1 %v3495_v12  ;;  %v5240_v21 = vrot.slane %v4946_v18, %v3879_v16  ;;  %v3035_v51 = vmul.f32 %v3021_v40, %v4942_v8  ;;  %v3042_v18 = vld [vmem:[#allocation8 + $0x62] ss:$8 sm:$0xf] }
 0x328   :  { %v2947_v3 = vmul.f32 %v5238_v43, %v4824_v26  ;;  %v2974_v19 = vmul.f32 %v5239_v56, %v4816_v54  ;;  %v3497_v62 = vpack.c.bf16 %v2916_v48, %v2886_v13  ;;  %3248 = vmatprep.mubr.f32.mxu1 %v5202_v31  ;;  %v5241_v54 = vrot.slane %v4885_v44, %v3874_v10  ;;  %v3312_v60 = vld [vmem:[%s5170_s3 + $0x10] sm:$0xff]  ;;  %v3272_v12 = vld [vmem:[#allocation3 + $0x18] sm:$0xff]  ;;  %s3669_s3 = smov [#allocation9]  }
 0x329   :  { %v2976_v6 = vmul.f32 %v5240_v21, %v4844_v59  ;;  %v3483_v26 = vpack.c.bf16 %v2975_v5, %v2945_v57  ;;  %v2987_v9 = vrot.slane %v4952_v28, %v3874_v10  ;;  %v3037_v22 = vmul.f32 %v3029_v1, %v4966_v34  ;;  %3482 = vmatpush1.bf16.msra.mxu0 %v3481_v2  ;;  %v3270_v5 = vld [vmem:[#allocation3 + $0x8] sm:$0xff]  ;;  %s3291_s9 = sshll.u32 %s3669_s3, 4  ;;  %s3292_s9 = int_to_ptr.vmem [resolvable:$true] %s3291_s9 }
 0x32a   :  { %v2944_v45 = vmul.f32 %v5241_v54, %v4809_v37  ;;  %v3499_v59 = vpack.c.bf16 %v2977_v30, %v2947_v3  ;;  %v5242_v8 = vrot.slane %v4885_v44, %v3879_v16  ;;  %v5243_v31 = vrot.slane %v4952_v28, %v3876_v11  ;;  %3498 = vmatpush1.bf16.msra.mxu1 %v3497_v62  ;;  %s3616_s10 = scalar_lea.vmem %s3292_s9, 512  ;;  %p3621_p11 = scmp.lt.s32.totalorder %s3292_s9, %s3292_s9 }
 0x32b   :  { %v2995_v37 = vrot.slane %v4952_v28, %v3879_v16  ;;  %3484 = vmatprep.subr.bf16.mxu0 %v3483_v26  ;;  %v5244_v34 = vrot.slane %v4952_v28, %v3881_v17  ;;  %v3051_v52 = vrot.slane %v3042_v18, %v3876_v11  ;;  %v3004_v20 = vmul.f32 %v2987_v9, %v5247_v61  ;;  %v5248_v28 = vld [vmem:[#allocation14_spill] sm:$0xff]  ;;  %p3617_p10 = scmp.ne.s32.totalorder %s3292_s9, %s3616_s10  ;;  %p3622_p12 = scmp.lt.s32.totalorder %s3616_s10, %s3616_s10 }
 0x32c   :  { %v2946_v40 = vmul.f32 %v5242_v8, %v4830_v50  ;;  %v3005_v27 = vmul.f32 %v5243_v31, %v4957_v0  ;;  %v3485_v38 = vpack.c.bf16 %v2974_v19, %v2944_v45  ;;  %v5245_v50 = vrot.slane %v4969_v47, %v3874_v10  ;;  %3500 = vmatprep.subr.bf16.mxu1 %v3499_v59 }
 0x32d   :  { %v3007_v1 = vmul.f32 %v5244_v34, %v4927_v41  ;;  %v3036_v0 = vmul.f32 %v3025_v49, %v5246_v53  ;;  %v3059_v46 = vrot.slane %v3042_v18, %v3881_v17  ;;  %v3006_v41 = vmul.f32 %v2995_v37, %v5248_v28  ;;  %p3623_p13 = por %p3622_p12, %p3621_p11 }
 0x32e   :  { %v3034_v44 = vmul.f32 %v5245_v50, %v4918_v58  ;;  %v3501_v35 = vpack.c.bf16 %v2976_v6, %v2946_v40  ;;  %v3487_v55 = vpack.c.bf16 %v3035_v51, %v3005_v27  ;;  %3486 = vmatpush1.bf16.msra.mxu0 %v3485_v38  ;;  %v3047_v58 = vrot.slane %v3042_v18, %v3874_v10 }
 0x32f   :  { %v3503_v36 = vpack.c.bf16 %v3037_v22, %v3007_v1  ;;  %v3505_v47 = vpack.c.bf16 %v3036_v0, %v3006_v41  ;;  %v3065_v32 = vmul.f32 %v3051_v52, %v5022_v24  ;;  %v3055_v11 = vrot.slane %v3042_v18, %v3879_v16  ;;  %v3263_v16 = vpop.permute.xlu0 %3262  ;;  %p3624_p0 = pnand %p3623_p13, %p3617_p10 }
 0x330   :  { %3488 = vmatprep.subr.bf16.mxu0 %v3487_v55  ;;  %3502 = vmatpush1.bf16.msra.mxu1 %v3501_v35  ;;  %v3489_v4 = vpack.c.bf16 %v3034_v44, %v3004_v20  ;;  %v3067_v15 = vmul.f32 %v3059_v46, %v5038_v63  ;;  %v3064_v17 = vmul.f32 %v3047_v58, %v4993_v7  ;;  %v3269_v63 = vld [vmem:[#allocation3] sm:$0xff] }
 0x331   :  { %3504 = vmatprep.subr.bf16.mxu1 %v3503_v36  ;;  %v3066_v10 = vmul.f32 %v3055_v11, %v5034_v29 }
 0x332   :  { %3490 = vmatpush1.bf16.msra.mxu0 %v3489_v4 }
 0x333   :  { %3129 = vmatprep.subr.mxu0 %v3065_v32 }
 0x334   :  { %3506 = vmatpush1.bf16.msra.mxu1 %v3505_v47 }
 0x335   :  { %3200 = vmatprep.subr.mxu1 %v3067_v15 }
 0x336   :  { %3130 = vmatpush1.msra.mxu0 %v3064_v17 }
 0x337   :  { %3313 = vmatmul.mubr.msk.f32.vlgmr.msra.gmra.mrb[2].mxu0 %vm922_vm10, %v3312_v60 }
 0x338   :  { %3201 = vmatpush1.msra.mxu1 %v3066_v10 }
 0x339   :  { %3314 = vmatmul.mubr.msk.f32.vlgmr.msra.gmra.mrb[2].mxu1 %vm922_vm10, %v3312_v60 }
 0x40a   :  { %v3179_v24 = vpop.f32.mrb[2].mxu0 }
 0x40b   :  { %v3265_v23 = vadd.f32 %v3263_v16, %v3179_v24  ;;  %v3181_v48 = vpop.f32.mrb[3].mxu0 }
 0x40c   :  { %v3250_v7 = vpop.f32.mrb[2].mxu1  ;;  %v3266_v33 = vadd.f32 %v3263_v16, %v3181_v48 }
 0x40d   :  { %v3267_v42 = vadd.f32 %v3263_v16, %v3250_v7  ;;  %v3252_v30 = vpop.f32.mrb[3].mxu1  ;;  %v3273_v39 = vadd.f32 %v3269_v63, %v3265_v23 }
 0x40e   :  { %v3268_v29 = vadd.f32 %v3263_v16, %v3252_v30  ;;  %v3274_v13 = vadd.f32 %v3270_v5, %v3266_v33 }
 0x40f   :  { %v3275_v25 = vadd.f32 %v3271_v14, %v3267_v42  ;;  %v3277_v57 = vmax.f32 %v3273_v39, 0.0 }
 0x410   :  { %v3276_v49 = vadd.f32 %v3272_v12, %v3268_v29  ;;  %v3278_v2 = vmax.f32 %v3274_v13, 0.0 }
 0x411   :  { %v3279_v43 = vmax.f32 %v3275_v25, 0.0  ;;  %3281 = vst [vmem:[#allocation9] sm:$0xff] %v3277_v57 }
 0x412   :  { %v3280_v3 = vmax.f32 %v3276_v49, 0.0  ;;  %3282 = vst [vmem:[#allocation9 + $0x8] sm:$0xff] %v3278_v2 }
 0x413   :  { %3283 = vst [vmem:[#allocation9 + $0x10] sm:$0xff] %v3279_v43 }
 0x414   :  { %3284 = vst [vmem:[#allocation9 + $0x18] sm:$0xff] %v3280_v3 }
 0x415   :  { %3627 = shalt.err (!%p3624_p0)
}
 0x416   :  { %s3628_s5 = scalar_lea.hbm %s5173_s6, 512 }
 0x417   :  { %p3629_p1 = scmp.ne.s32.totalorder %s5173_s6, %s3628_s5  ;;  %p3632_p2 = scmp.lt.u32.totalorder %s3628_s5, %s5173_s6 }
 0x419   :  { %p3634_p3 = pnand %p3632_p2, %p3629_p1 }
 0x41b   :  { %3637 = shalt.err (!%p3634_p3)
}
 0x41c   :  { %3294 = dma.vmem_to_hbm [thread:$0]  %s3292_s9, 512, %s5173_s6, [#allocation5]  }
 0x41d   :  { %3642 = dma.done.wait [#allocation5], 512  }
 0x41e   :  { %3643 = vsyncadd [#allocation5], 4294966784 }
 0x41f   :  { %3298 = vsyncpa [#allocation4], 1 }
 0x420   :  { %3299 = vsyncpa [#allocation7], 1 }
 0x421   :  { %3300 = vsyncpa [#allocation5], 1 }

</bundles_post_ra>
